<compile_context>
chip_gen: v5e
topology: v5e:2x2
jax: 0.10.0
libtpu: 0.0.40
codegen_flags: <defaults>
</compile_context>

<pallas_src>
import functools
import math

import jax
import jax.numpy as jnp
from jax.experimental import pallas as pl
from jax.experimental.pallas import tpu as pltpu

_F32 = jnp.float32
_BF16 = jnp.bfloat16


# --------------------------------------------------------------------------
# small helpers
# --------------------------------------------------------------------------
def _layer_norm(x, gamma, beta, eps):
    mu = jnp.mean(x, axis=-1, keepdims=True)
    var = jnp.mean(jnp.square(x - mu), axis=-1, keepdims=True)
    return (x - mu) * jax.lax.rsqrt(var + eps) * gamma + beta


@functools.cache
def _vmem_cap_bytes():
    try:
        return int(pltpu.get_tpu_info().vmem_capacity_bytes)
    except Exception:
        return 64 << 20                    # conservative (v7x-sized) fallback


def _vmem_limit(need_bytes):
    """Honest scoped-VMEM budget: estimated need + headroom, capped by chip."""
    cap = _vmem_cap_bytes() - (8 << 20)
    return int(max(min(int(need_bytes) + (8 << 20), cap), 8 << 20))


def _row_tile(R, resident_bytes, bytes_per_row, target=512):
    """Sublane-aligned row tile: full extent when R <= target, otherwise
    `target` (grid = cdiv(R, TR); Pallas masks the ragged final block).
    Halved while the estimated VMEM footprint would not fit the chip."""
    if R <= target:
        return R
    cap = _vmem_cap_bytes() - (8 << 20)
    tr = target
    while tr > 64 and resident_bytes + tr * bytes_per_row + (8 << 20) > cap:
        tr //= 2
    return tr


@functools.cache
def _weight_buffer_count():
    """Probe once whether single-buffered (pipeline_mode=pl.Buffered(1))
    grid-invariant BlockSpecs are supported by this build; 0 -> default."""
    def k(x_ref, w_ref, o_ref):
        o_ref[...] = x_ref[...] + w_ref[...]
    try:
        f = pl.pallas_call(
            k,
            out_shape=jax.ShapeDtypeStruct((8, 128), _F32),
            grid=(2,),
            in_specs=[pl.BlockSpec((8, 128), lambda i: (0, 0)),
                      pl.BlockSpec((8, 128), lambda i: (0, 0),
                                   pipeline_mode=pl.Buffered(1))],
            out_specs=pl.BlockSpec((8, 128), lambda i: (0, 0)),
        )
        jax.block_until_ready(f(jnp.zeros((8, 128), _F32),
                                jnp.ones((8, 128), _F32)))
        return 1
    except Exception:
        return 0


@functools.cache
def _gelu_in_bf16():
    """bf16 GELU unloads the single EUP slot on v6e/v7x; v5e and older have no
    bf16 VPU/EUP, so keep the f32 path there."""
    try:
        kind = jax.devices()[0].device_kind.lower()
    except Exception:
        return True
    return not any(t in kind for t in ("v2", "v3", "v4", "v5"))


def _weight_spec(shape, buffer_count):
    """BlockSpec for a grid-invariant weight (constant index_map)."""
    nd = len(shape)
    idx = lambda *_: (0,) * nd
    if buffer_count == 1:
        return pl.BlockSpec(shape, idx, pipeline_mode=pl.Buffered(1))
    return pl.BlockSpec(shape, idx)


# --------------------------------------------------------------------------
# kernels
# --------------------------------------------------------------------------
def _ln_qkv_kernel(eps, x_ref, g_ref, b_ref, w_ref, bias_ref, o_ref):
    """LayerNorm1 + fused QKV projection for a tile of (B*S) rows."""
    x = x_ref[...].astype(_F32)                                 # (TR, D)
    xn = _layer_norm(x, g_ref[...], b_ref[...], eps)
    y = jnp.dot(xn.astype(_BF16), w_ref[...],                   # bf16 MXU operands
                preferred_element_type=_F32)                    # f32 accumulation
    o_ref[...] = (y + bias_ref[...]).astype(o_ref.dtype)        # bf16 qkv out


def _attn_kernel(num_heads, head_dim, qkv_ref, o_ref):
    """Softmax attention for one batch element; all heads processed
    back-to-back inside the cell. q is pre-scaled by 1/sqrt(Dh) (folded into
    wqkv host-side). Head split/merge via static column slices: no transposes,
    output written directly in (S, D) layout."""
    H, Dh = num_heads, head_dim
    D = H * Dh
    for h in range(H):                                          # static, H small
        q = qkv_ref[:, h * Dh:(h + 1) * Dh]                     # (S, Dh) bf16
        k = qkv_ref[:, D + h * Dh:D + (h + 1) * Dh]
        v = qkv_ref[:, 2 * D + h * Dh:2 * D + (h + 1) * Dh]
        s = jnp.einsum('qd,kd->qk', q, k,
                       preferred_element_type=_F32)             # (S, S) f32
        s = s - jnp.max(s, axis=-1, keepdims=True)
        p = jnp.exp(s)
        inv = 1.0 / jnp.sum(p, axis=-1, keepdims=True)          # exact, (S, 1)
        o = jnp.dot(p.astype(v.dtype), v,
                    preferred_element_type=_F32)                # (S, Dh) f32
        o_ref[:, h * Dh:(h + 1) * Dh] = (o * inv).astype(o_ref.dtype)


def _proj_mlp_kernel(eps, gelu_bf16, attn_ref, x_ref, wo_ref, bo_ref, g2_ref,
                     b2_ref, w1_ref, b1_ref, w2_ref, b2b_ref, o_ref):
    """Attention out-projection + residual 1 + LayerNorm2 + MLP + residual 2
    for a tile of (B*S) rows."""
    x = x_ref[...].astype(_F32)                                 # (TR, D)
    x1 = jnp.dot(attn_ref[...], wo_ref[...],
                 preferred_element_type=_F32) + bo_ref[...] + x
    xn = _layer_norm(x1, g2_ref[...], b2_ref[...], eps)
    h = jnp.dot(xn.astype(_BF16), w1_ref[...],
                preferred_element_type=_F32) + b1_ref[...]
    if gelu_bf16:
        h = h.astype(_BF16)                                     # halves EUP pressure
    # TODO(synk): PyTorch nn.GELU default is exact erf-GELU; tanh approximation
    # used here (max abs diff ~1e-3).
    h = jax.nn.gelu(h, approximate=True)
    y = jnp.dot(h.astype(_BF16), w2_ref[...],
                preferred_element_type=_F32) + b2b_ref[...]
    o_ref[...] = (y + x1).astype(o_ref.dtype)


# --------------------------------------------------------------------------
# pallas_call wrappers
# --------------------------------------------------------------------------
def _ln_qkv_proj(x2d, gamma, beta, w, bias, eps, buffer_count):
    R, D = x2d.shape
    N = w.shape[1]                                              # 3*D
    wmult = 1 if buffer_count == 1 else 2
    resident = wmult * sum(int(a.size) * a.dtype.itemsize
                           for a in (gamma, beta, w, bias))
    per_row = 2 * (D * 4 + N * 2) + (D * 4 + N * 4)             # streamed x2 + f32 temps
    TR = _row_tile(R, resident, per_row)
    return pl.pallas_call(
        functools.partial(_ln_qkv_kernel, eps),
        out_shape=jax.ShapeDtypeStruct((R, N), _BF16),
        grid=(pl.cdiv(R, TR),),
        in_specs=[pl.BlockSpec((TR, D), lambda r: (r, 0)),
                  _weight_spec(gamma.shape, buffer_count),
                  _weight_spec(beta.shape, buffer_count),
                  _weight_spec(w.shape, buffer_count),
                  _weight_spec(bias.shape, buffer_count)],
        out_specs=pl.BlockSpec((TR, N), lambda r: (r, 0)),
        compiler_params=pltpu.CompilerParams(
            dimension_semantics=("parallel",),
            vmem_limit_bytes=_vmem_limit(resident + TR * per_row)),
    )(x2d, gamma, beta, w, bias)


def _attention(qkv3, num_heads, head_dim):
    B, S, N = qkv3.shape
    D = num_heads * head_dim
    need = 2 * (S * N * 2 + S * D * 2) + 3 * S * S * 4 + S * D * 4
    return pl.pallas_call(
        functools.partial(_attn_kernel, num_heads, head_dim),
        out_shape=jax.ShapeDtypeStruct((B, S, D), _BF16),
        grid=(B,),
        in_specs=[pl.BlockSpec((None, S, N), lambda b: (b, 0, 0))],
        out_specs=pl.BlockSpec((None, S, D), lambda b: (b, 0, 0)),
        compiler_params=pltpu.CompilerParams(
            dimension_semantics=("parallel",),
            vmem_limit_bytes=_vmem_limit(need)),
    )(qkv3)


def _proj_residual_mlp(attn2d, x2d, p, eps, buffer_count, gelu_bf16):
    R, D = x2d.shape
    M = p['w1'].shape[1]
    weights = (p['wo'], p['bo'], p['ln2_g'], p['ln2_b'],
               p['w1'], p['b1'], p['w2'], p['b2'])
    wmult = 1 if buffer_count == 1 else 2
    resident = wmult * sum(int(w.size) * w.dtype.itemsize for w in weights)
    per_row = (2 * (D * 2 + D * 4 + D * 4)                      # streamed attn/x/out x2
               + M * 4 + M * 2 + 3 * D * 4)                     # f32 h, bf16 gelu, temps
    TR = _row_tile(R, resident, per_row)
    row_spec = pl.BlockSpec((TR, D), lambda r: (r, 0))
    return pl.pallas_call(
        functools.partial(_proj_mlp_kernel, eps, gelu_bf16),
        out_shape=jax.ShapeDtypeStruct((R, D), x2d.dtype),
        grid=(pl.cdiv(R, TR),),
        in_specs=[row_spec, row_spec]
                 + [_weight_spec(w.shape, buffer_count) for w in weights],
        out_specs=row_spec,
        compiler_params=pltpu.CompilerParams(
            dimension_semantics=("parallel",),
            vmem_limit_bytes=_vmem_limit(resident + TR * per_row)),
    )(attn2d, x2d, *weights)


# --------------------------------------------------------------------------
# forward pass
# --------------------------------------------------------------------------
@functools.partial(jax.jit, static_argnames=("num_heads", "eps",
                                             "weight_buffer_count", "gelu_bf16"))
def _forward(x, params, num_heads, eps, weight_buffer_count, gelu_bf16):
    B, S, D = x.shape
    H = num_heads
    assert D % H == 0, "embedding_dim must be divisible by num_heads"
    Dh = D // H
    x2d = x.reshape(B * S, D)

    # LayerNorm1 + fused QKV projection (row-tiled cdiv grid over B*S).
    qkv = _ln_qkv_proj(x2d, params['ln1_g'], params['ln1_b'],
                       params['wqkv'], params['bqkv'], eps,
                       weight_buffer_count)                     # (B*S, 3D) bf16

    # Per-batch attention; heads handled inside the kernel (free reshapes only,
    # no XLA head split/merge transposes).
    attn = _attention(qkv.reshape(B, S, 3 * D), H, Dh)          # (B, S, D) bf16

    # out-projection + residual 1 + LayerNorm2 + MLP + residual 2
    out2d = _proj_residual_mlp(attn.reshape(B * S, D), x2d, params, eps,
                               weight_buffer_count, gelu_bf16)
    return out2d.reshape(B, S, D)


def vision_transformer_block(x, params, num_heads, eps=1e-6):
    """x: (B, S, D) float32. params: prepare_params(init_params(...)).
    Dropout layers are identity (inference)."""
    return _forward(x, params, num_heads, eps,
                    _weight_buffer_count(), _gelu_in_bf16())


# --------------------------------------------------------------------------
# parameters
# --------------------------------------------------------------------------
def init_params(key, embedding_dim, num_heads, mlp_size, dtype=jnp.float32):
    """Deterministic synthetic parameter init (shapes match the PyTorch module).
    Weights are stored as (in_features, out_features) so kernels compute x @ W + b."""
    D, M = embedding_dim, mlp_size
    ks = jax.random.split(key, 6)
    std = 0.02
    return {
        # MHA block
        'ln1_g': jnp.ones((1, D), dtype),
        'ln1_b': jnp.zeros((1, D), dtype),
        'wqkv': (jax.random.normal(ks[0], (D, 3 * D)) * std).astype(dtype),
        'bqkv': jnp.zeros((1, 3 * D), dtype),
        'wo':   (jax.random.normal(ks[1], (D, D)) * std).astype(dtype),
        'bo':   jnp.zeros((1, D), dtype),
        # MLP block
        'ln2_g': jnp.ones((1, D), dtype),
        'ln2_b': jnp.zeros((1, D), dtype),
        'w1':   (jax.random.normal(ks[2], (D, M)) * std).astype(dtype),
        'b1':   (jax.random.normal(ks[3], (1, M)) * std).astype(dtype),
        'w2':   (jax.random.normal(ks[4], (M, D)) * std).astype(dtype),
        'b2':   (jax.random.normal(ks[5], (1, D)) * std).astype(dtype),
    }


def prepare_params(params, num_heads):
    """One-time host-side prep: cast weight matrices to bf16 (MXU operands,
    f32 accumulation in-kernel) and fold the 1/sqrt(Dh) attention scale into
    the Q columns of the fused QKV projection. Biases / LN params stay f32."""
    D = params['wqkv'].shape[0]
    Dh = D // num_heads
    scale = 1.0 / math.sqrt(Dh)
    q_scale = jnp.concatenate([jnp.full((D,), scale, jnp.float32),
                               jnp.ones((2 * D,), jnp.float32)])[None, :]
    wqkv = params['wqkv'].astype(jnp.float32) * q_scale
    bqkv = params['bqkv'].astype(jnp.float32) * q_scale
    return {
        'ln1_g': params['ln1_g'].astype(jnp.float32),
        'ln1_b': params['ln1_b'].astype(jnp.float32),
        'wqkv': wqkv.astype(_BF16),
        'bqkv': bqkv,
        'wo': params['wo'].astype(_BF16),
        'bo': params['bo'].astype(jnp.float32),
        'ln2_g': params['ln2_g'].astype(jnp.float32),
        'ln2_b': params['ln2_b'].astype(jnp.float32),
        'w1': params['w1'].astype(_BF16),
        'b1': params['b1'].astype(jnp.float32),
        'w2': params['w2'].astype(_BF16),
        'b2': params['b2'].astype(jnp.float32),
    }


# --------------------------------------------------------------------------
# demo
# --------------------------------------------------------------------------
if __name__ == "__main__":
    # Small smoke-test shapes (tokens (B, S, D)); real ViT-B would be
    # D=768, mlp=3072, S=197, num_heads=12.
    B, S, D = 2, 8, 32
    NUM_HEADS = 4
    MLP_SIZE = 64

    key = jax.random.PRNGKey(0)
    k_x, k_p = jax.random.split(key)
    x = jax.random.normal(k_x, (B, S, D), dtype=jnp.float32)
    params = prepare_params(init_params(k_p, D, NUM_HEADS, MLP_SIZE), NUM_HEADS)

    out = vision_transformer_block(x, params, NUM_HEADS)
    out = jax.block_until_ready(out)
    assert out.shape == (B, S, D) and out.dtype == jnp.float32
    print("KERNEL_OK")
</pallas_src>

<mosaic_0001>
module attributes {stable_mosaic.version = 11 : i64} {
  func.func @k(%arg0: i32, %arg1: memref<8x128xf32, #tpu.memory_space<vmem>>, %arg2: memref<8x128xf32, #tpu.memory_space<vmem>>, %arg3: memref<8x128xf32, #tpu.memory_space<vmem>>) attributes {dimension_semantics = [#tpu.dimension_semantics<arbitrary>], iteration_bounds = array<i64: 2>, scalar_prefetch = 0 : i64, scratch_operands = 0 : i64, tpu.core_type = #tpu.core_type<tc>, window_params = [{pipeline_mode = #tpu.pipeline_mode<synchronous>, transform_indices = @transform_0, window_bounds = array<i64: 8, 128>}, {pipeline_mode = #tpu.pipeline_mode<synchronous>, transform_indices = @transform_1, window_bounds = array<i64: 8, 128>}, {pipeline_mode = #tpu.pipeline_mode<synchronous>, transform_indices = @transform_2, window_bounds = array<i64: 8, 128>}]} {
    %c0 = arith.constant 0 : index
    %c0_0 = arith.constant 0 : index
    %0 = vector.load %arg1[%c0, %c0_0] : memref<8x128xf32, #tpu.memory_space<vmem>>, vector<8x128xf32>
    %c0_1 = arith.constant 0 : index
    %c0_2 = arith.constant 0 : index
    %1 = vector.load %arg2[%c0_1, %c0_2] : memref<8x128xf32, #tpu.memory_space<vmem>>, vector<8x128xf32>
    %2 = arith.addf %0, %1 : vector<8x128xf32>
    %c0_3 = arith.constant 0 : index
    %c0_4 = arith.constant 0 : index
    %3 = vector.load %arg3[%c0_3, %c0_4] : memref<8x128xf32, #tpu.memory_space<vmem>>, vector<8x128xf32>
    tpu.vector_store %arg3[%c0_3, %c0_4], %2 {strides = array<i32>} : memref<8x128xf32, #tpu.memory_space<vmem>>, vector<8x128xf32>,
    return
  }
  func.func @transform_0(%arg0: i32) -> (i32, i32) {
    %c0_i32 = arith.constant 0 : i32
    %c0_i32_0 = arith.constant 0 : i32
    %c0_i32_1 = arith.constant 0 : i32
    return %c0_i32, %c0_i32_0 : i32, i32
  }
  func.func @transform_1(%arg0: i32) -> (i32, i32) {
    %c0_i32 = arith.constant 0 : i32
    %c0_i32_0 = arith.constant 0 : i32
    %c0_i32_1 = arith.constant 0 : i32
    return %c0_i32, %c0_i32_0 : i32, i32
  }
  func.func @transform_2(%arg0: i32) -> (i32, i32) {
    %c0_i32 = arith.constant 0 : i32
    %c0_i32_0 = arith.constant 0 : i32
    %c0_i32_1 = arith.constant 0 : i32
    return %c0_i32, %c0_i32_0 : i32, i32
  }
}

module attributes {stable_mosaic.version = 11 : i64} {
  func.func @_proj_mlp_kernel(%arg0: i32, %arg1: memref<16x32xbf16, #tpu.memory_space<vmem>>, %arg2: memref<16x32xf32, #tpu.memory_space<vmem>>, %arg3: memref<32x32xbf16, #tpu.memory_space<vmem>>, %arg4: memref<1x32xf32, #tpu.memory_space<vmem>>, %arg5: memref<1x32xf32, #tpu.memory_space<vmem>>, %arg6: memref<1x32xf32, #tpu.memory_space<vmem>>, %arg7: memref<32x64xbf16, #tpu.memory_space<vmem>>, %arg8: memref<1x64xf32, #tpu.memory_space<vmem>>, %arg9: memref<64x32xbf16, #tpu.memory_space<vmem>>, %arg10: memref<1x32xf32, #tpu.memory_space<vmem>>, %arg11: memref<16x32xf32, #tpu.memory_space<vmem>>) attributes {dimension_semantics = [#tpu.dimension_semantics<parallel>], iteration_bounds = array<i64: 1>, scalar_prefetch = 0 : i64, scratch_operands = 0 : i64, tpu.core_type = #tpu.core_type<tc>, window_params = [{transform_indices = @transform_0, window_bounds = array<i64: 16, 32>}, {transform_indices = @transform_1, window_bounds = array<i64: 16, 32>}, {pipeline_mode = #tpu.pipeline_mode<synchronous>, transform_indices = @transform_2, window_bounds = array<i64: 32, 32>}, {pipeline_mode = #tpu.pipeline_mode<synchronous>, transform_indices = @transform_3, window_bounds = array<i64: 1, 32>}, {pipeline_mode = #tpu.pipeline_mode<synchronous>, transform_indices = @transform_4, window_bounds = array<i64: 1, 32>}, {pipeline_mode = #tpu.pipeline_mode<synchronous>, transform_indices = @transform_5, window_bounds = array<i64: 1, 32>}, {pipeline_mode = #tpu.pipeline_mode<synchronous>, transform_indices = @transform_6, window_bounds = array<i64: 32, 64>}, {pipeline_mode = #tpu.pipeline_mode<synchronous>, transform_indices = @transform_7, window_bounds = array<i64: 1, 64>}, {pipeline_mode = #tpu.pipeline_mode<synchronous>, transform_indices = @transform_8, window_bounds = array<i64: 64, 32>}, {pipeline_mode = #tpu.pipeline_mode<synchronous>, transform_indices = @transform_9, window_bounds = array<i64: 1, 32>}, {transform_indices = @transform_10, window_bounds = array<i64: 16, 32>}]} {
    %c0 = arith.constant 0 : index
    %c0_0 = arith.constant 0 : index
    %0 = vector.load %arg2[%c0, %c0_0] : memref<16x32xf32, #tpu.memory_space<vmem>>, vector<16x32xf32>
    %c0_1 = arith.constant 0 : index
    %c0_2 = arith.constant 0 : index
    %1 = vector.load %arg1[%c0_1, %c0_2] : memref<16x32xbf16, #tpu.memory_space<vmem>>, vector<16x32xbf16>
    %c0_3 = arith.constant 0 : index
    %c0_4 = arith.constant 0 : index
    %2 = vector.load %arg3[%c0_3, %c0_4] : memref<32x32xbf16, #tpu.memory_space<vmem>>, vector<32x32xbf16>
    %cst = arith.constant dense<0.000000e+00> : vector<16x32xf32>
    %3 = tpu.matmul %1, %2, %cst {dimension_numbers = #tpu.dot_dimension_numbers<[1], [0], [0], [1], [0, 0, 1, 1], [], []>} : vector<16x32xbf16>, vector<32x32xbf16>, vector<16x32xf32> -> vector<16x32xf32>
    %c0_5 = arith.constant 0 : index
    %c0_6 = arith.constant 0 : index
    %4 = vector.load %arg4[%c0_5, %c0_6] : memref<1x32xf32, #tpu.memory_space<vmem>>, vector<1x32xf32>
    %5 = vector.broadcast %4 : vector<1x32xf32> to vector<16x32xf32>
    %6 = arith.addf %3, %5 : vector<16x32xf32>
    %7 = arith.addf %6, %0 : vector<16x32xf32>
    %c0_7 = arith.constant 0 : index
    %c0_8 = arith.constant 0 : index
    %8 = vector.load %arg5[%c0_7, %c0_8] : memref<1x32xf32, #tpu.memory_space<vmem>>, vector<1x32xf32>
    %c0_9 = arith.constant 0 : index
    %c0_10 = arith.constant 0 : index
    %9 = vector.load %arg6[%c0_9, %c0_10] : memref<1x32xf32, #tpu.memory_space<vmem>>, vector<1x32xf32>
    %cst_11 = arith.constant dense<0.000000e+00> : vector<16xf32>
    %10 = vector.multi_reduction <add>, %7, %cst_11 [1] : vector<16x32xf32> to vector<16xf32>
    %11 = vector.shape_cast %10 : vector<16xf32> to vector<16x1xf32>
    %cst_12 = arith.constant 3.200000e+01 : f32
    %12 = vector.broadcast %cst_12 : f32 to vector<16x1xf32>
    %13 = arith.divf %11, %12 : vector<16x1xf32>
    %14 = vector.broadcast %13 : vector<16x1xf32> to vector<16x32xf32>
    %15 = arith.subf %7, %14 : vector<16x32xf32>
    %16 = arith.mulf %15, %15 : vector<16x32xf32>
    %cst_13 = arith.constant dense<0.000000e+00> : vector<16xf32>
    %17 = vector.multi_reduction <add>, %16, %cst_13 [1] : vector<16x32xf32> to vector<16xf32>
    %18 = vector.shape_cast %17 : vector<16xf32> to vector<16x1xf32>
    %cst_14 = arith.constant 3.200000e+01 : f32
    %19 = vector.broadcast %cst_14 : f32 to vector<16x1xf32>
    %20 = arith.divf %18, %19 : vector<16x1xf32>
    %21 = vector.broadcast %13 : vector<16x1xf32> to vector<16x32xf32>
    %22 = arith.subf %7, %21 : vector<16x32xf32>
    %cst_15 = arith.constant 9.99999997E-7 : f32
    %23 = vector.broadcast %cst_15 : f32 to vector<16x1xf32>
    %24 = arith.addf %20, %23 : vector<16x1xf32>
    %25 = math.rsqrt %24 : vector<16x1xf32>
    %26 = vector.broadcast %25 : vector<16x1xf32> to vector<16x32xf32>
    %27 = arith.mulf %22, %26 : vector<16x32xf32>
    %28 = vector.broadcast %8 : vector<1x32xf32> to vector<16x32xf32>
    %29 = arith.mulf %27, %28 : vector<16x32xf32>
    %30 = vector.broadcast %9 : vector<1x32xf32> to vector<16x32xf32>
    %31 = arith.addf %29, %30 : vector<16x32xf32>
    %32 = arith.truncf %31 : vector<16x32xf32> to vector<16x32xbf16>
    %c0_16 = arith.constant 0 : index
    %c0_17 = arith.constant 0 : index
    %33 = vector.load %arg7[%c0_16, %c0_17] : memref<32x64xbf16, #tpu.memory_space<vmem>>, vector<32x64xbf16>
    %cst_18 = arith.constant dense<0.000000e+00> : vector<16x64xf32>
    %34 = tpu.matmul %32, %33, %cst_18 {dimension_numbers = #tpu.dot_dimension_numbers<[1], [0], [0], [1], [0, 0, 1, 1], [], []>} : vector<16x32xbf16>, vector<32x64xbf16>, vector<16x64xf32> -> vector<16x64xf32>
    %c0_19 = arith.constant 0 : index
    %c0_20 = arith.constant 0 : index
    %35 = vector.load %arg8[%c0_19, %c0_20] : memref<1x64xf32, #tpu.memory_space<vmem>>, vector<1x64xf32>
    %36 = vector.broadcast %35 : vector<1x64xf32> to vector<16x64xf32>
    %37 = arith.addf %34, %36 : vector<16x64xf32>
    %38 = arith.truncf %37 : vector<16x64xf32> to vector<16x64xbf16>
    %39 = arith.mulf %38, %38 : vector<16x64xbf16>
    %40 = arith.mulf %38, %39 : vector<16x64xbf16>
    %cst_21 = arith.constant 4.467770e-02 : bf16
    %41 = vector.broadcast %cst_21 : bf16 to vector<16x64xbf16>
    %42 = arith.mulf %41, %40 : vector<16x64xbf16>
    %43 = arith.addf %38, %42 : vector<16x64xbf16>
    %cst_22 = arith.constant 7.968750e-01 : bf16
    %44 = vector.broadcast %cst_22 : bf16 to vector<16x64xbf16>
    %45 = arith.mulf %44, %43 : vector<16x64xbf16>
    %46 = math.tanh %45 : vector<16x64xbf16>
    %cst_23 = arith.constant 1.000000e+00 : bf16
    %47 = vector.broadcast %cst_23 : bf16 to vector<16x64xbf16>
    %48 = arith.addf %47, %46 : vector<16x64xbf16>
    %cst_24 = arith.constant 5.000000e-01 : bf16
    %49 = vector.broadcast %cst_24 : bf16 to vector<16x64xbf16>
    %50 = arith.mulf %49, %48 : vector<16x64xbf16>
    %51 = arith.mulf %38, %50 : vector<16x64xbf16>
    %c0_25 = arith.constant 0 : index
    %c0_26 = arith.constant 0 : index
    %52 = vector.load %arg9[%c0_25, %c0_26] : memref<64x32xbf16, #tpu.memory_space<vmem>>, vector<64x32xbf16>
    %cst_27 = arith.constant dense<0.000000e+00> : vector<16x32xf32>
    %53 = tpu.matmul %51, %52, %cst_27 {dimension_numbers = #tpu.dot_dimension_numbers<[1], [0], [0], [1], [0, 0, 1, 1], [], []>} : vector<16x64xbf16>, vector<64x32xbf16>, vector<16x32xf32> -> vector<16x32xf32>
    %c0_28 = arith.constant 0 : index
    %c0_29 = arith.constant 0 : index
    %54 = vector.load %arg10[%c0_28, %c0_29] : memref<1x32xf32, #tpu.memory_space<vmem>>, vector<1x32xf32>
    %55 = vector.broadcast %54 : vector<1x32xf32> to vector<16x32xf32>
    %56 = arith.addf %53, %55 : vector<16x32xf32>
    %57 = arith.addf %56, %7 : vector<16x32xf32>
    %c0_30 = arith.constant 0 : index
    %c0_31 = arith.constant 0 : index
    %58 = vector.load %arg11[%c0_30, %c0_31] : memref<16x32xf32, #tpu.memory_space<vmem>>, vector<16x32xf32>
    tpu.vector_store %arg11[%c0_30, %c0_31], %57 {strides = array<i32>} : memref<16x32xf32, #tpu.memory_space<vmem>>, vector<16x32xf32>,
    return
  }
  func.func @transform_0(%arg0: i32) -> (i32, i32) {
    %c0_i32 = arith.constant 0 : i32
    %c0_i32_0 = arith.constant 0 : i32
    return %arg0, %c0_i32 : i32, i32
  }
  func.func @transform_1(%arg0: i32) -> (i32, i32) {
    %c0_i32 = arith.constant 0 : i32
    %c0_i32_0 = arith.constant 0 : i32
    return %arg0, %c0_i32 : i32, i32
  }
  func.func @transform_2(%arg0: i32) -> (i32, i32) {
    %c0_i32 = arith.constant 0 : i32
    %c0_i32_0 = arith.constant 0 : i32
    %c0_i32_1 = arith.constant 0 : i32
    return %c0_i32, %c0_i32_0 : i32, i32
  }
  func.func @transform_3(%arg0: i32) -> (i32, i32) {
    %c0_i32 = arith.constant 0 : i32
    %c0_i32_0 = arith.constant 0 : i32
    %c0_i32_1 = arith.constant 0 : i32
    return %c0_i32, %c0_i32_0 : i32, i32
  }
  func.func @transform_4(%arg0: i32) -> (i32, i32) {
    %c0_i32 = arith.constant 0 : i32
    %c0_i32_0 = arith.constant 0 : i32
    %c0_i32_1 = arith.constant 0 : i32
    return %c0_i32, %c0_i32_0 : i32, i32
  }
  func.func @transform_5(%arg0: i32) -> (i32, i32) {
    %c0_i32 = arith.constant 0 : i32
    %c0_i32_0 = arith.constant 0 : i32
    %c0_i32_1 = arith.constant 0 : i32
    return %c0_i32, %c0_i32_0 : i32, i32
  }
  func.func @transform_6(%arg0: i32) -> (i32, i32) {
    %c0_i32 = arith.constant 0 : i32
    %c0_i32_0 = arith.constant 0 : i32
    %c0_i32_1 = arith.constant 0 : i32
    return %c0_i32, %c0_i32_0 : i32, i32
  }
  func.func @transform_7(%arg0: i32) -> (i32, i32) {
    %c0_i32 = arith.constant 0 : i32
    %c0_i32_0 = arith.constant 0 : i32
    %c0_i32_1 = arith.constant 0 : i32
    return %c0_i32, %c0_i32_0 : i32, i32
  }
  func.func @transform_8(%arg0: i32) -> (i32, i32) {
    %c0_i32 = arith.constant 0 : i32
    %c0_i32_0 = arith.constant 0 : i32
    %c0_i32_1 = arith.constant 0 : i32
    return %c0_i32, %c0_i32_0 : i32, i32
  }
  func.func @transform_9(%arg0: i32) -> (i32, i32) {
    %c0_i32 = arith.constant 0 : i32
    %c0_i32_0 = arith.constant 0 : i32
    %c0_i32_1 = arith.constant 0 : i32
    return %c0_i32, %c0_i32_0 : i32, i32
  }
  func.func @transform_10(%arg0: i32) -> (i32, i32) {
    %c0_i32 = arith.constant 0 : i32
    %c0_i32_0 = arith.constant 0 : i32
    return %arg0, %c0_i32 : i32, i32
  }
}

module attributes {stable_mosaic.version = 11 : i64} {
  func.func @_ln_qkv_kernel(%arg0: i32, %arg1: memref<16x32xf32, #tpu.memory_space<vmem>>, %arg2: memref<1x32xf32, #tpu.memory_space<vmem>>, %arg3: memref<1x32xf32, #tpu.memory_space<vmem>>, %arg4: memref<32x96xbf16, #tpu.memory_space<vmem>>, %arg5: memref<1x96xf32, #tpu.memory_space<vmem>>, %arg6: memref<16x96xbf16, #tpu.memory_space<vmem>>) attributes {dimension_semantics = [#tpu.dimension_semantics<parallel>], iteration_bounds = array<i64: 1>, scalar_prefetch = 0 : i64, scratch_operands = 0 : i64, tpu.core_type = #tpu.core_type<tc>, window_params = [{transform_indices = @transform_0, window_bounds = array<i64: 16, 32>}, {pipeline_mode = #tpu.pipeline_mode<synchronous>, transform_indices = @transform_1, window_bounds = array<i64: 1, 32>}, {pipeline_mode = #tpu.pipeline_mode<synchronous>, transform_indices = @transform_2, window_bounds = array<i64: 1, 32>}, {pipeline_mode = #tpu.pipeline_mode<synchronous>, transform_indices = @transform_3, window_bounds = array<i64: 32, 96>}, {pipeline_mode = #tpu.pipeline_mode<synchronous>, transform_indices = @transform_4, window_bounds = array<i64: 1, 96>}, {transform_indices = @transform_5, window_bounds = array<i64: 16, 96>}]} {
    %c0 = arith.constant 0 : index
    %c0_0 = arith.constant 0 : index
    %0 = vector.load %arg1[%c0, %c0_0] : memref<16x32xf32, #tpu.memory_space<vmem>>, vector<16x32xf32>
    %c0_1 = arith.constant 0 : index
    %c0_2 = arith.constant 0 : index
    %1 = vector.load %arg2[%c0_1, %c0_2] : memref<1x32xf32, #tpu.memory_space<vmem>>, vector<1x32xf32>
    %c0_3 = arith.constant 0 : index
    %c0_4 = arith.constant 0 : index
    %2 = vector.load %arg3[%c0_3, %c0_4] : memref<1x32xf32, #tpu.memory_space<vmem>>, vector<1x32xf32>
    %cst = arith.constant dense<0.000000e+00> : vector<16xf32>
    %3 = vector.multi_reduction <add>, %0, %cst [1] : vector<16x32xf32> to vector<16xf32>
    %4 = vector.shape_cast %3 : vector<16xf32> to vector<16x1xf32>
    %cst_5 = arith.constant 3.200000e+01 : f32
    %5 = vector.broadcast %cst_5 : f32 to vector<16x1xf32>
    %6 = arith.divf %4, %5 : vector<16x1xf32>
    %7 = vector.broadcast %6 : vector<16x1xf32> to vector<16x32xf32>
    %8 = arith.subf %0, %7 : vector<16x32xf32>
    %9 = arith.mulf %8, %8 : vector<16x32xf32>
    %cst_6 = arith.constant dense<0.000000e+00> : vector<16xf32>
    %10 = vector.multi_reduction <add>, %9, %cst_6 [1] : vector<16x32xf32> to vector<16xf32>
    %11 = vector.shape_cast %10 : vector<16xf32> to vector<16x1xf32>
    %cst_7 = arith.constant 3.200000e+01 : f32
    %12 = vector.broadcast %cst_7 : f32 to vector<16x1xf32>
    %13 = arith.divf %11, %12 : vector<16x1xf32>
    %14 = vector.broadcast %6 : vector<16x1xf32> to vector<16x32xf32>
    %15 = arith.subf %0, %14 : vector<16x32xf32>
    %cst_8 = arith.constant 9.99999997E-7 : f32
    %16 = vector.broadcast %cst_8 : f32 to vector<16x1xf32>
    %17 = arith.addf %13, %16 : vector<16x1xf32>
    %18 = math.rsqrt %17 : vector<16x1xf32>
    %19 = vector.broadcast %18 : vector<16x1xf32> to vector<16x32xf32>
    %20 = arith.mulf %15, %19 : vector<16x32xf32>
    %21 = vector.broadcast %1 : vector<1x32xf32> to vector<16x32xf32>
    %22 = arith.mulf %20, %21 : vector<16x32xf32>
    %23 = vector.broadcast %2 : vector<1x32xf32> to vector<16x32xf32>
    %24 = arith.addf %22, %23 : vector<16x32xf32>
    %25 = arith.truncf %24 : vector<16x32xf32> to vector<16x32xbf16>
    %c0_9 = arith.constant 0 : index
    %c0_10 = arith.constant 0 : index
    %26 = vector.load %arg4[%c0_9, %c0_10] : memref<32x96xbf16, #tpu.memory_space<vmem>>, vector<32x96xbf16>
    %cst_11 = arith.constant dense<0.000000e+00> : vector<16x96xf32>
    %27 = tpu.matmul %25, %26, %cst_11 {dimension_numbers = #tpu.dot_dimension_numbers<[1], [0], [0], [1], [0, 0, 1, 1], [], []>} : vector<16x32xbf16>, vector<32x96xbf16>, vector<16x96xf32> -> vector<16x96xf32>
    %c0_12 = arith.constant 0 : index
    %c0_13 = arith.constant 0 : index
    %28 = vector.load %arg5[%c0_12, %c0_13] : memref<1x96xf32, #tpu.memory_space<vmem>>, vector<1x96xf32>
    %29 = vector.broadcast %28 : vector<1x96xf32> to vector<16x96xf32>
    %30 = arith.addf %27, %29 : vector<16x96xf32>
    %31 = arith.truncf %30 : vector<16x96xf32> to vector<16x96xbf16>
    %c0_14 = arith.constant 0 : index
    %c0_15 = arith.constant 0 : index
    %32 = vector.load %arg6[%c0_14, %c0_15] : memref<16x96xbf16, #tpu.memory_space<vmem>>, vector<16x96xbf16>
    tpu.vector_store %arg6[%c0_14, %c0_15], %31 {strides = array<i32>} : memref<16x96xbf16, #tpu.memory_space<vmem>>, vector<16x96xbf16>,
    return
  }
  func.func @transform_0(%arg0: i32) -> (i32, i32) {
    %c0_i32 = arith.constant 0 : i32
    %c0_i32_0 = arith.constant 0 : i32
    return %arg0, %c0_i32 : i32, i32
  }
  func.func @transform_1(%arg0: i32) -> (i32, i32) {
    %c0_i32 = arith.constant 0 : i32
    %c0_i32_0 = arith.constant 0 : i32
    %c0_i32_1 = arith.constant 0 : i32
    return %c0_i32, %c0_i32_0 : i32, i32
  }
  func.func @transform_2(%arg0: i32) -> (i32, i32) {
    %c0_i32 = arith.constant 0 : i32
    %c0_i32_0 = arith.constant 0 : i32
    %c0_i32_1 = arith.constant 0 : i32
    return %c0_i32, %c0_i32_0 : i32, i32
  }
  func.func @transform_3(%arg0: i32) -> (i32, i32) {
    %c0_i32 = arith.constant 0 : i32
    %c0_i32_0 = arith.constant 0 : i32
    %c0_i32_1 = arith.constant 0 : i32
    return %c0_i32, %c0_i32_0 : i32, i32
  }
  func.func @transform_4(%arg0: i32) -> (i32, i32) {
    %c0_i32 = arith.constant 0 : i32
    %c0_i32_0 = arith.constant 0 : i32
    %c0_i32_1 = arith.constant 0 : i32
    return %c0_i32, %c0_i32_0 : i32, i32
  }
  func.func @transform_5(%arg0: i32) -> (i32, i32) {
    %c0_i32 = arith.constant 0 : i32
    %c0_i32_0 = arith.constant 0 : i32
    return %arg0, %c0_i32 : i32, i32
  }
}

module attributes {stable_mosaic.version = 11 : i64} {
  func.func @_attn_kernel(%arg0: i32, %arg1: memref<1x8x96xbf16, #tpu.memory_space<vmem>>, %arg2: memref<1x8x32xbf16, #tpu.memory_space<vmem>>) attributes {dimension_semantics = [#tpu.dimension_semantics<parallel>], iteration_bounds = array<i64: 2>, scalar_prefetch = 0 : i64, scratch_operands = 0 : i64, tpu.core_type = #tpu.core_type<tc>, window_params = [{transform_indices = @transform_0, window_bounds = array<i64: 1, 8, 96>}, {transform_indices = @transform_1, window_bounds = array<i64: 1, 8, 32>}]} {
    %c0 = arith.constant 0 : index
    %c0_0 = arith.constant 0 : index
    %c0_1 = arith.constant 0 : index
    %0 = vector.load %arg1[%c0, %c0_0, %c0_1] : memref<1x8x96xbf16, #tpu.memory_space<vmem>>, vector<1x8x8xbf16>
    %1 = vector.shape_cast %0 : vector<1x8x8xbf16> to vector<8x8xbf16>
    %c0_2 = arith.constant 0 : index
    %c0_3 = arith.constant 0 : index
    %c32 = arith.constant 32 : index
    %2 = vector.load %arg1[%c0_2, %c0_3, %c32] : memref<1x8x96xbf16, #tpu.memory_space<vmem>>, vector<1x8x8xbf16>
    %3 = vector.shape_cast %2 : vector<1x8x8xbf16> to vector<8x8xbf16>
    %c0_4 = arith.constant 0 : index
    %c0_5 = arith.constant 0 : index
    %c64 = arith.constant 64 : index
    %4 = vector.load %arg1[%c0_4, %c0_5, %c64] : memref<1x8x96xbf16, #tpu.memory_space<vmem>>, vector<1x8x8xbf16>
    %5 = vector.shape_cast %4 : vector<1x8x8xbf16> to vector<8x8xbf16>
    "tpu.trace_start"() <{level = 10 : i32, message = "qd,kd->qk"}> : () -> ()
    %cst = arith.constant dense<0.000000e+00> : vector<8x8xf32>
    %6 = tpu.matmul %1, %3, %cst {dimension_numbers = #tpu.dot_dimension_numbers<[1], [1], [0], [0], [0, 0, 1, 0], [], []>} : vector<8x8xbf16>, vector<8x8xbf16>, vector<8x8xf32> -> vector<8x8xf32>
    "tpu.trace_stop"() : () -> ()
    %cst_6 = arith.constant dense<0xFF800000> : vector<8xf32>
    %7 = vector.multi_reduction <maximumf>, %6, %cst_6 [1] : vector<8x8xf32> to vector<8xf32>
    %8 = vector.shape_cast %7 : vector<8xf32> to vector<8x1xf32>
    %9 = vector.broadcast %8 : vector<8x1xf32> to vector<8x8xf32>
    %10 = arith.subf %6, %9 : vector<8x8xf32>
    %11 = math.exp %10 : vector<8x8xf32>
    %cst_7 = arith.constant dense<0.000000e+00> : vector<8xf32>
    %12 = vector.multi_reduction <add>, %11, %cst_7 [1] : vector<8x8xf32> to vector<8xf32>
    %13 = vector.shape_cast %12 : vector<8xf32> to vector<8x1xf32>
    %cst_8 = arith.constant 1.000000e+00 : f32
    %14 = vector.broadcast %cst_8 : f32 to vector<8x1xf32>
    %15 = arith.divf %14, %13 : vector<8x1xf32>
    %16 = arith.truncf %11 : vector<8x8xf32> to vector<8x8xbf16>
    %cst_9 = arith.constant dense<0.000000e+00> : vector<8x8xf32>
    %17 = tpu.matmul %16, %5, %cst_9 {dimension_numbers = #tpu.dot_dimension_numbers<[1], [0], [0], [1], [0, 0, 1, 1], [], []>} : vector<8x8xbf16>, vector<8x8xbf16>, vector<8x8xf32> -> vector<8x8xf32>
    %18 = vector.broadcast %15 : vector<8x1xf32> to vector<8x8xf32>
    %19 = arith.mulf %17, %18 : vector<8x8xf32>
    %20 = arith.truncf %19 : vector<8x8xf32> to vector<8x8xbf16>
    %c0_10 = arith.constant 0 : index
    %c0_11 = arith.constant 0 : index
    %c0_12 = arith.constant 0 : index
    %21 = vector.load %arg2[%c0_10, %c0_11, %c0_12] : memref<1x8x32xbf16, #tpu.memory_space<vmem>>, vector<1x8x8xbf16>
    %22 = vector.shape_cast %21 : vector<1x8x8xbf16> to vector<8x8xbf16>
    %23 = vector.shape_cast %20 : vector<8x8xbf16> to vector<1x8x8xbf16>
    tpu.vector_store %arg2[%c0_10, %c0_11, %c0_12], %23 {strides = array<i32>} : memref<1x8x32xbf16, #tpu.memory_space<vmem>>, vector<1x8x8xbf16>,
    %c0_13 = arith.constant 0 : index
    %c0_14 = arith.constant 0 : index
    %c8 = arith.constant 8 : index
    %24 = vector.load %arg1[%c0_13, %c0_14, %c8] : memref<1x8x96xbf16, #tpu.memory_space<vmem>>, vector<1x8x8xbf16>
    %25 = vector.shape_cast %24 : vector<1x8x8xbf16> to vector<8x8xbf16>
    %c0_15 = arith.constant 0 : index
    %c0_16 = arith.constant 0 : index
    %c40 = arith.constant 40 : index
    %26 = vector.load %arg1[%c0_15, %c0_16, %c40] : memref<1x8x96xbf16, #tpu.memory_space<vmem>>, vector<1x8x8xbf16>
    %27 = vector.shape_cast %26 : vector<1x8x8xbf16> to vector<8x8xbf16>
    %c0_17 = arith.constant 0 : index
    %c0_18 = arith.constant 0 : index
    %c72 = arith.constant 72 : index
    %28 = vector.load %arg1[%c0_17, %c0_18, %c72] : memref<1x8x96xbf16, #tpu.memory_space<vmem>>, vector<1x8x8xbf16>
    %29 = vector.shape_cast %28 : vector<1x8x8xbf16> to vector<8x8xbf16>
    "tpu.trace_start"() <{level = 10 : i32, message = "qd,kd->qk"}> : () -> ()
    %cst_19 = arith.constant dense<0.000000e+00> : vector<8x8xf32>
    %30 = tpu.matmul %25, %27, %cst_19 {dimension_numbers = #tpu.dot_dimension_numbers<[1], [1], [0], [0], [0, 0, 1, 0], [], []>} : vector<8x8xbf16>, vector<8x8xbf16>, vector<8x8xf32> -> vector<8x8xf32>
    "tpu.trace_stop"() : () -> ()
    %cst_20 = arith.constant dense<0xFF800000> : vector<8xf32>
    %31 = vector.multi_reduction <maximumf>, %30, %cst_20 [1] : vector<8x8xf32> to vector<8xf32>
    %32 = vector.shape_cast %31 : vector<8xf32> to vector<8x1xf32>
    %33 = vector.broadcast %32 : vector<8x1xf32> to vector<8x8xf32>
    %34 = arith.subf %30, %33 : vector<8x8xf32>
    %35 = math.exp %34 : vector<8x8xf32>
    %cst_21 = arith.constant dense<0.000000e+00> : vector<8xf32>
    %36 = vector.multi_reduction <add>, %35, %cst_21 [1] : vector<8x8xf32> to vector<8xf32>
    %37 = vector.shape_cast %36 : vector<8xf32> to vector<8x1xf32>
    %cst_22 = arith.constant 1.000000e+00 : f32
    %38 = vector.broadcast %cst_22 : f32 to vector<8x1xf32>
    %39 = arith.divf %38, %37 : vector<8x1xf32>
    %40 = arith.truncf %35 : vector<8x8xf32> to vector<8x8xbf16>
    %cst_23 = arith.constant dense<0.000000e+00> : vector<8x8xf32>
    %41 = tpu.matmul %40, %29, %cst_23 {dimension_numbers = #tpu.dot_dimension_numbers<[1], [0], [0], [1], [0, 0, 1, 1], [], []>} : vector<8x8xbf16>, vector<8x8xbf16>, vector<8x8xf32> -> vector<8x8xf32>
    %42 = vector.broadcast %39 : vector<8x1xf32> to vector<8x8xf32>
    %43 = arith.mulf %41, %42 : vector<8x8xf32>
    %44 = arith.truncf %43 : vector<8x8xf32> to vector<8x8xbf16>
    %c0_24 = arith.constant 0 : index
    %c0_25 = arith.constant 0 : index
    %c8_26 = arith.constant 8 : index
    %45 = vector.load %arg2[%c0_24, %c0_25, %c8_26] : memref<1x8x32xbf16, #tpu.memory_space<vmem>>, vector<1x8x8xbf16>
    %46 = vector.shape_cast %45 : vector<1x8x8xbf16> to vector<8x8xbf16>
    %47 = vector.shape_cast %44 : vector<8x8xbf16> to vector<1x8x8xbf16>
    tpu.vector_store %arg2[%c0_24, %c0_25, %c8_26], %47 {strides = array<i32>} : memref<1x8x32xbf16, #tpu.memory_space<vmem>>, vector<1x8x8xbf16>,
    %c0_27 = arith.constant 0 : index
    %c0_28 = arith.constant 0 : index
    %c16 = arith.constant 16 : index
    %48 = vector.load %arg1[%c0_27, %c0_28, %c16] : memref<1x8x96xbf16, #tpu.memory_space<vmem>>, vector<1x8x8xbf16>
    %49 = vector.shape_cast %48 : vector<1x8x8xbf16> to vector<8x8xbf16>
    %c0_29 = arith.constant 0 : index
    %c0_30 = arith.constant 0 : index
    %c48 = arith.constant 48 : index
    %50 = vector.load %arg1[%c0_29, %c0_30, %c48] : memref<1x8x96xbf16, #tpu.memory_space<vmem>>, vector<1x8x8xbf16>
    %51 = vector.shape_cast %50 : vector<1x8x8xbf16> to vector<8x8xbf16>
    %c0_31 = arith.constant 0 : index
    %c0_32 = arith.constant 0 : index
    %c80 = arith.constant 80 : index
    %52 = vector.load %arg1[%c0_31, %c0_32, %c80] : memref<1x8x96xbf16, #tpu.memory_space<vmem>>, vector<1x8x8xbf16>
    %53 = vector.shape_cast %52 : vector<1x8x8xbf16> to vector<8x8xbf16>
    "tpu.trace_start"() <{level = 10 : i32, message = "qd,kd->qk"}> : () -> ()
    %cst_33 = arith.constant dense<0.000000e+00> : vector<8x8xf32>
    %54 = tpu.matmul %49, %51, %cst_33 {dimension_numbers = #tpu.dot_dimension_numbers<[1], [1], [0], [0], [0, 0, 1, 0], [], []>} : vector<8x8xbf16>, vector<8x8xbf16>, vector<8x8xf32> -> vector<8x8xf32>
    "tpu.trace_stop"() : () -> ()
    %cst_34 = arith.constant dense<0xFF800000> : vector<8xf32>
    %55 = vector.multi_reduction <maximumf>, %54, %cst_34 [1] : vector<8x8xf32> to vector<8xf32>
    %56 = vector.shape_cast %55 : vector<8xf32> to vector<8x1xf32>
    %57 = vector.broadcast %56 : vector<8x1xf32> to vector<8x8xf32>
    %58 = arith.subf %54, %57 : vector<8x8xf32>
    %59 = math.exp %58 : vector<8x8xf32>
    %cst_35 = arith.constant dense<0.000000e+00> : vector<8xf32>
    %60 = vector.multi_reduction <add>, %59, %cst_35 [1] : vector<8x8xf32> to vector<8xf32>
    %61 = vector.shape_cast %60 : vector<8xf32> to vector<8x1xf32>
    %cst_36 = arith.constant 1.000000e+00 : f32
    %62 = vector.broadcast %cst_36 : f32 to vector<8x1xf32>
    %63 = arith.divf %62, %61 : vector<8x1xf32>
    %64 = arith.truncf %59 : vector<8x8xf32> to vector<8x8xbf16>
    %cst_37 = arith.constant dense<0.000000e+00> : vector<8x8xf32>
    %65 = tpu.matmul %64, %53, %cst_37 {dimension_numbers = #tpu.dot_dimension_numbers<[1], [0], [0], [1], [0, 0, 1, 1], [], []>} : vector<8x8xbf16>, vector<8x8xbf16>, vector<8x8xf32> -> vector<8x8xf32>
    %66 = vector.broadcast %63 : vector<8x1xf32> to vector<8x8xf32>
    %67 = arith.mulf %65, %66 : vector<8x8xf32>
    %68 = arith.truncf %67 : vector<8x8xf32> to vector<8x8xbf16>
    %c0_38 = arith.constant 0 : index
    %c0_39 = arith.constant 0 : index
    %c16_40 = arith.constant 16 : index
    %69 = vector.load %arg2[%c0_38, %c0_39, %c16_40] : memref<1x8x32xbf16, #tpu.memory_space<vmem>>, vector<1x8x8xbf16>
    %70 = vector.shape_cast %69 : vector<1x8x8xbf16> to vector<8x8xbf16>
    %71 = vector.shape_cast %68 : vector<8x8xbf16> to vector<1x8x8xbf16>
    tpu.vector_store %arg2[%c0_38, %c0_39, %c16_40], %71 {strides = array<i32>} : memref<1x8x32xbf16, #tpu.memory_space<vmem>>, vector<1x8x8xbf16>,
    %c0_41 = arith.constant 0 : index
    %c0_42 = arith.constant 0 : index
    %c24 = arith.constant 24 : index
    %72 = vector.load %arg1[%c0_41, %c0_42, %c24] : memref<1x8x96xbf16, #tpu.memory_space<vmem>>, vector<1x8x8xbf16>
    %73 = vector.shape_cast %72 : vector<1x8x8xbf16> to vector<8x8xbf16>
    %c0_43 = arith.constant 0 : index
    %c0_44 = arith.constant 0 : index
    %c56 = arith.constant 56 : index
    %74 = vector.load %arg1[%c0_43, %c0_44, %c56] : memref<1x8x96xbf16, #tpu.memory_space<vmem>>, vector<1x8x8xbf16>
    %75 = vector.shape_cast %74 : vector<1x8x8xbf16> to vector<8x8xbf16>
    %c0_45 = arith.constant 0 : index
    %c0_46 = arith.constant 0 : index
    %c88 = arith.constant 88 : index
    %76 = vector.load %arg1[%c0_45, %c0_46, %c88] : memref<1x8x96xbf16, #tpu.memory_space<vmem>>, vector<1x8x8xbf16>
    %77 = vector.shape_cast %76 : vector<1x8x8xbf16> to vector<8x8xbf16>
    "tpu.trace_start"() <{level = 10 : i32, message = "qd,kd->qk"}> : () -> ()
    %cst_47 = arith.constant dense<0.000000e+00> : vector<8x8xf32>
    %78 = tpu.matmul %73, %75, %cst_47 {dimension_numbers = #tpu.dot_dimension_numbers<[1], [1], [0], [0], [0, 0, 1, 0], [], []>} : vector<8x8xbf16>, vector<8x8xbf16>, vector<8x8xf32> -> vector<8x8xf32>
    "tpu.trace_stop"() : () -> ()
    %cst_48 = arith.constant dense<0xFF800000> : vector<8xf32>
    %79 = vector.multi_reduction <maximumf>, %78, %cst_48 [1] : vector<8x8xf32> to vector<8xf32>
    %80 = vector.shape_cast %79 : vector<8xf32> to vector<8x1xf32>
    %81 = vector.broadcast %80 : vector<8x1xf32> to vector<8x8xf32>
    %82 = arith.subf %78, %81 : vector<8x8xf32>
    %83 = math.exp %82 : vector<8x8xf32>
    %cst_49 = arith.constant dense<0.000000e+00> : vector<8xf32>
    %84 = vector.multi_reduction <add>, %83, %cst_49 [1] : vector<8x8xf32> to vector<8xf32>
    %85 = vector.shape_cast %84 : vector<8xf32> to vector<8x1xf32>
    %cst_50 = arith.constant 1.000000e+00 : f32
    %86 = vector.broadcast %cst_50 : f32 to vector<8x1xf32>
    %87 = arith.divf %86, %85 : vector<8x1xf32>
    %88 = arith.truncf %83 : vector<8x8xf32> to vector<8x8xbf16>
    %cst_51 = arith.constant dense<0.000000e+00> : vector<8x8xf32>
    %89 = tpu.matmul %88, %77, %cst_51 {dimension_numbers = #tpu.dot_dimension_numbers<[1], [0], [0], [1], [0, 0, 1, 1], [], []>} : vector<8x8xbf16>, vector<8x8xbf16>, vector<8x8xf32> -> vector<8x8xf32>
    %90 = vector.broadcast %87 : vector<8x1xf32> to vector<8x8xf32>
    %91 = arith.mulf %89, %90 : vector<8x8xf32>
    %92 = arith.truncf %91 : vector<8x8xf32> to vector<8x8xbf16>
    %c0_52 = arith.constant 0 : index
    %c0_53 = arith.constant 0 : index
    %c24_54 = arith.constant 24 : index
    %93 = vector.load %arg2[%c0_52, %c0_53, %c24_54] : memref<1x8x32xbf16, #tpu.memory_space<vmem>>, vector<1x8x8xbf16>
    %94 = vector.shape_cast %93 : vector<1x8x8xbf16> to vector<8x8xbf16>
    %95 = vector.shape_cast %92 : vector<8x8xbf16> to vector<1x8x8xbf16>
    tpu.vector_store %arg2[%c0_52, %c0_53, %c24_54], %95 {strides = array<i32>} : memref<1x8x32xbf16, #tpu.memory_space<vmem>>, vector<1x8x8xbf16>,
    return
  }
  func.func @transform_0(%arg0: i32) -> (i32, i32, i32) {
    %c0_i32 = arith.constant 0 : i32
    %c0_i32_0 = arith.constant 0 : i32
    %c0_i32_1 = arith.constant 0 : i32
    return %arg0, %c0_i32, %c0_i32_0 : i32, i32, i32
  }
  func.func @transform_1(%arg0: i32) -> (i32, i32, i32) {
    %c0_i32 = arith.constant 0 : i32
    %c0_i32_0 = arith.constant 0 : i32
    %c0_i32_1 = arith.constant 0 : i32
    return %arg0, %c0_i32, %c0_i32_0 : i32, i32, i32
  }
}

</mosaic_0001>

<bundles_post_ra>
// kernel: tpu_custom_call.1
= control target key start
LH: loop header
LB: loop body
LE: loop exit
PB: predicated region body
PF: predicated region fallthrough
CT: control target
= control target key end

     0   :  { %7 = vsyncpa [#allocation3], 0  ;;  %s417_s0 = inlined_call_operand.hbm [shape: f32[8,128], index: 0, kind: input, shape index: {}]   ;;  %s418_s1 = inlined_call_operand.hbm [shape: f32[8,128], index: 1, kind: input, shape index: {}]   ;;  %s419_s2 = inlined_call_operand.hbm [shape: f32[8,128], index: 2, kind: output, shape index: {}]  }
   0x1   :  { %8 = vsyncpa [#allocation6], 0 }
   0x2   :  { %9 = vsyncpa [#allocation4], 0  ;;  %s375_s9 = smov 0  }
   0x3 LB: > { %s95_s12 = sshll.u32 %s417_s0, 4  ;;  %s202_s13 = sadd.s32 4294967295, %s355_s9   ;;  %s355_s9 = sphi %s375_s9, %s15_s9   ;;  %s96_s12 = int_to_ptr.hbm [resolvable:$true] %s95_s12 }
   0x4   : > { %p203_p0 = scmp.ge.s32.totalorder %s355_s9, 1  ;;  %p83_p1 = scmp.lt.s32.totalorder %s355_s9, 3 }
   0x5   : > { %p386_p2 = scmp.eq.s32.totalorder %s202_s13, 0  ;;  %s357_s16 = smov [#allocation2]  }
   0x6   : > { %p390_p3 = pnand %p203_p0, %p83_p1  ;;  %s97_s17 = sshll.u32 %s357_s16, 4  ;;  %s98_s17 = int_to_ptr.vmem [resolvable:$true] %s97_s17 }
   0x7   : > { %s107_s20 = sshll.u32 %s418_s1, 4  ;;  %s358_s21 = smov [#allocation5]   ;;  %s108_s20 = int_to_ptr.hbm [resolvable:$true] %s107_s20 }
   0x8   : > { %p225_p4 = pneg %p390_p3  ;;  %s109_s22 = sshll.u32 %s358_s21, 4  ;;  %s110_s22 = int_to_ptr.vmem [resolvable:$true] %s109_s22 }
   0x9   : > { %122 = sbr.rel (%p390_p3) target bundleno = 24 (0x18), region = 28 }
   0xa   : > { %p226_p5 = pnand %p386_p2, %p225_p4 }
   0xc   : > { %228 = dma.hbm_to_vmem [thread:$0]  (!%p226_p5), %s96_s12, 128, %s98_s17, [#allocation3]  }
   0xd   : > { %231 = dma.hbm_to_vmem [thread:$0]  (!%p226_p5), %s108_s20, 128, %s110_s22, [#allocation6]  }
   0xe   : > { %342 = dma.done.wait (%p386_p2), [#allocation3], 128  }
   0xf   : > { %344 = vsyncadd (%p386_p2), [#allocation3], 4294967168 }
  0x10   : > { %346 = dma.done.wait (%p386_p2), [#allocation6], 128  }
  0x11   : > { %348 = vsyncadd (%p386_p2), [#allocation6], 4294967168  ;;  %s359_s23 = smov [#allocation7]   ;;  %s152_s27 = sshll.u32 %s419_s2, 4  ;;  %v140_v0 = vld [vmem:[#allocation2] sm:$0xff]  ;;  %v141_v1 = vld [vmem:[#allocation5] sm:$0xff]  ;;  %s153_s27 = int_to_ptr.hbm [resolvable:$true] %s152_s27 }
  0x12   : > { %s150_s24 = sshll.u32 %s359_s23, 4  ;;  %p236_p6 = scmp.eq.s32.totalorder %s202_s13, 1  ;;  %v142_v2 = vadd.f32 %v141_v1, %v140_v0  ;;  %s151_s24 = int_to_ptr.vmem [resolvable:$true] %s150_s24 }
  0x14   : > { %143 = vst [vmem:[#allocation7] sm:$0xff] %v142_v2 }
  0x15   : > { %222 = dma.vmem_to_hbm [thread:$0]  (%p236_p6), %s151_s24, 128, %s153_s27, [#allocation4]  }
  0x16   : > { %350 = dma.done.wait (%p236_p6), [#allocation4], 128  }
  0x17   : > { %352 = vsyncadd (%p236_p6), [#allocation4], 4294967168 }
  0x18 PF: > { %s15_s9 = sadd.s32 1, %s355_s9  }
  0x19   : > { %p12_p7 = scmp.ge.s32.totalorder %s15_s9, 4  }
  0x1b   :  { %14 = sbr.rel (!%p12_p7) target bundleno = 3 (0x3), region = 61 }
  0x20   :  { %166 = vsyncpa [#allocation3], 1 }
  0x21   :  { %168 = vsyncpa [#allocation3 + $0x1], 1 }
  0x22   :  { %169 = vsyncpa [#allocation6], 1 }
  0x23   :  { %170 = vsyncpa [#allocation4], 1 }
  0x24   :  { %172 = vsyncpa [#allocation4 + $0x1], 1 }

// kernel: _forward.5
= control target key start
LH: loop header
LB: loop body
LE: loop exit
PB: predicated region body
PF: predicated region fallthrough
CT: control target
= control target key end

     0   :  { %15 = vsyncpa [#allocation3], 0  ;;  %s589_s0 = inlined_call_operand.vmem [shape: bf16[16,32], index: 0, kind: input, shape index: {}]   ;;  %s590_s1 = inlined_call_operand.vmem [shape: f32[16,32], index: 1, kind: input, shape index: {}]   ;;  %s591_s2 = inlined_call_operand.vmem [shape: bf16[32,32], index: 2, kind: input, shape index: {}]   ;;  %s592_s3 = inlined_call_operand.vmem [shape: f32[1,32], index: 3, kind: input, shape index: {}]   ;;  %s593_s4 = inlined_call_operand.vmem [shape: f32[1,32], index: 4, kind: input, shape index: {}]   ;;  %s594_s5 = inlined_call_operand.vmem [shape: f32[1,32], index: 5, kind: input, shape index: {}]   ;;  %s595_s6 = inlined_call_operand.vmem [shape: bf16[32,64], index: 6, kind: input, shape index: {}]   ;;  %s596_s7 = inlined_call_operand.vmem [shape: f32[1,64], index: 7, kind: input, shape index: {}]   ;;  %s597_s8 = inlined_call_operand.vmem [shape: bf16[64,32], index: 8, kind: input, shape index: {}]   ;;  %s598_s9 = inlined_call_operand.hbm [shape: f32[1,32], index: 9, kind: input, shape index: {}]   ;;  %s599_s10 = inlined_call_operand.hbm [shape: f32[16,32], index: 10, kind: output, shape index: {}]  }
   0x1   :  { %16 = vsyncpa [#allocation4], 0  ;;  %s40_s15 = sshll.u32 %s598_s9, 4  ;;  %s453_s16 = smov [#allocation2]   ;;  %s41_s15 = int_to_ptr.hbm [resolvable:$true] %s40_s15 }
   0x2   :  { %s42_s17 = sshll.u32 %s453_s16, 4  ;;  %s43_s17 = int_to_ptr.vmem [resolvable:$true] %s42_s17 }
   0x3   :  { %45 = dma.hbm_to_vmem [thread:$0]  %s41_s15, 16, %s43_s17, [#allocation3]  }
   0x4   :  { %449 = dma.done.wait [#allocation3], 16  }
   0x5   :  { %450 = vsyncadd [#allocation3], 4294967280  ;;  %v374_v0 = vld [vmem:[%s591_s2 + $0x8] sm:$0xff]  ;;  %v373_v1 = vld [vmem:[%s591_s2] sm:$0xff]  ;;  %vm80_vm0 = vcmask 261120   ;;  %v454_v14 = vmov 32.0  }
   0x6   :  { %90 = vmatpush.bf16.msra.mxu0 %v374_v0  ;;  %v372_v2 = vld [vmem:[%s589_s0] sm:$0xff]  ;;  %v52_v9 = vld [vmem:[%s590_s1 + $0x8] sm:$0xff]  ;;  %391 = vrcp.f32 %v454_v14  ;;  %vm292_vm8 = vcmask 523264   ;;  %s320_s22 = sshll.u32 %s599_s10, 4  ;;  %s456_s23 = smov 128   ;;  %s321_s22 = int_to_ptr.hbm [resolvable:$true] %s320_s22 }
   0x7   :  { %v386_v3 = vld [vmem:[%s592_s3] ss:$0 sm:$0xff]  ;;  %v376_v31 = vld [vmem:[%s595_s6 + $0x8] sm:$0xff]  ;;  %s457_s9 = smov 8  }
   0x8   :  { %v51_v4 = vld [vmem:[%s590_s1] sm:$0xff]  ;;  %193 = vmatpush.bf16.msra.mxu1 %v376_v31 }
   0x9   :  { %v375_v33 = vld [vmem:[%s595_s6] sm:$0xff] }
   0xa   :  { %91 = vmatpush.bf16.msra.mxu0 %v373_v1  ;;  %v387_v52 = vld [vmem:[%s593_s4] ss:$0 sm:$0xff] }
   0xb   :  { %v388_v57 = vld [vmem:[%s594_s5] ss:$0 sm:$0xff] }
   0xc   :  { %v392_v15 = vpop.eup %391  ;;  %194 = vmatpush.bf16.msra.mxu1 %v375_v33  ;;  %v389_v62 = vld [vmem:[%s596_s7] ss:$0 sm:$0xff] }
   0xd   :  { %345 = vmatmul.msk.bf16.vlgmr.msra.gmra.mxu0 %vm80_vm0, %v372_v2  ;;  %v109_v16 = vmul.f32 32.0, %v392_v15  ;;  %vm113_vm1 = vweird.f32 %v392_v15 }
   0xf   :  { %v110_v17 = vsub.f32 1.0, %v109_v16  ;;  %v379_v16 = vld [vmem:[%s597_s8 + $0x10] sm:$0xff] }
  0x11   :  { %v111_v18 = vmul.f32 %v392_v15, %v110_v17 }
  0x13   :  { %v112_v19 = vadd.f32 %v392_v15, %v111_v18 }
  0x15   :  { %v114_v20 = vsel %vm113_vm1, %v392_v15, %v112_v19 }
  0x8a   :  { %v93_v5 = vpop.f32.mrf.mxu0 }
  0x8b   :  { %v94_v6 = vadd.f32 %v386_v3, %v93_v5 }
  0x8d   :  { %v532_v7 = vadd.f32 %v94_v6, %v51_v4 }
  0x8f   :  { %v102_v8 = vsel %vm80_vm0, %v532_v7, 0.0 }
  0x90   :  { %103 = vadd.xlane.f32.xlu0 %v102_v8 }
  0x92   :  { %v95_v10 = vpop.f32.mrf.mxu0 }
  0x93   :  { %v96_v11 = vadd.f32 %v386_v3, %v95_v10 }
  0x95   :  { %v539_v12 = vadd.f32 %v96_v11, %v52_v9 }
  0x97   :  { %v105_v13 = vsel %vm80_vm0, %v539_v12, 0.0 }
  0x98   :  { %106 = vadd.xlane.f32.xlu0 %v105_v13  ;;  %v380_v13 = vld [vmem:[%s597_s8 + $0x18] sm:$0xff] }
  0x99   :  { %300 = vmatpush.bf16.msra.mxu2 %v380_v13 }
  0x9d   :  { %301 = vmatpush.bf16.msra.mxu2 %v379_v16 }
 0x103   :  { %v104_v21 = vpop.xlane.xlu0 %103 }
 0x104   :  { %v115_v22 = vmul.f32 %v114_v20, %v104_v21  ;;  %v378_v21 = vld [vmem:[%s597_s8 + $0x8] sm:$0xff] }
 0x105   :  { %302 = vmatpush.bf16.msra.mxu2 %v378_v21 }
 0x106   :  { %v117_v23 = vsub.f32 %v532_v7, %v115_v22 }
 0x108   :  { %v119_v24 = vmul.f32 %v117_v23, %v117_v23 }
 0x10a   :  { %v121_v25 = vsel %vm80_vm0, %v119_v24, 0.0 }
 0x10b   :  { %122 = vadd.xlane.f32.xlu1 %v121_v25  ;;  %v107_v26 = vpop.xlane.xlu0 %106 }
 0x10c   :  { %v116_v27 = vmul.f32 %v114_v20, %v107_v26  ;;  %v377_v26 = vld [vmem:[%s597_s8] sm:$0xff]  ;;  %s455_s8 = smov [#allocation5]  }
 0x10d   :  { %303 = vmatpush.bf16.msra.mxu2 %v377_v26  ;;  %s318_s19 = sshll.u32 %s455_s8, 4  ;;  %s319_s19 = int_to_ptr.vmem [resolvable:$true] %s318_s19 }
 0x10e   :  { %v118_v28 = vsub.f32 %v539_v12, %v116_v27 }
 0x110   :  { %v120_v29 = vmul.f32 %v118_v28, %v118_v28 }
 0x112   :  { %v124_v30 = vsel %vm80_vm0, %v120_v29, 0.0 }
 0x113   :  { %125 = vadd.xlane.f32.xlu1 %v124_v30 }
 0x17e   :  { %v123_v32 = vpop.xlane.xlu1 %122 }
 0x17f   :  { %v127_v34 = vmul.f32 %v123_v32, %v114_v20 }
 0x181   :  { %v129_v35 = vadd.f32 1e-06, %v127_v34 }
 0x183   :  { %393 = vrsqrt.f32 %v129_v35  ;;  %vm137_vm3 = vweird.f32 %v129_v35 }
 0x186   :  { %v126_v36 = vpop.xlane.xlu1 %125 }
 0x187   :  { %v128_v37 = vmul.f32 %v126_v36, %v114_v20 }
 0x189   :  { %v394_v38 = vpop.eup %393  ;;  %v130_v39 = vadd.f32 1e-06, %v128_v37 }
 0x18a   :  { %v132_v40 = vmul.f32 %v394_v38, %v129_v35  ;;  %vm138_vm2 = vweird.f32 %v394_v38 }
 0x18b   :  { %395 = vrsqrt.f32 %v130_v39  ;;  %vm139_vm4 = vmor %vm137_vm3, %vm138_vm2  ;;  %vm147_vm6 = vweird.f32 %v130_v39 }
 0x18c   :  { %v133_v41 = vmul.f32 %v394_v38, %v132_v40 }
 0x18e   :  { %v134_v42 = vmul.f32 0.5, %v133_v41 }
 0x190   :  { %v135_v43 = vsub.f32 1.5, %v134_v42 }
 0x191   :  { %v396_v44 = vpop.eup %395 }
 0x192   :  { %v136_v45 = vmul.f32 %v394_v38, %v135_v43  ;;  %v142_v46 = vmul.f32 %v396_v44, %v130_v39  ;;  %vm148_vm5 = vweird.f32 %v396_v44 }
 0x193   :  { %vm149_vm7 = vmor %vm147_vm6, %vm148_vm5 }
 0x194   :  { %v143_v47 = vmul.f32 %v396_v44, %v142_v46  ;;  %v140_v48 = vsel %vm139_vm4, %v394_v38, %v136_v45 }
 0x195   :  { %v151_v51 = vmul.f32 %v140_v48, %v117_v23 }
 0x196   :  { %v144_v49 = vmul.f32 0.5, %v143_v47 }
 0x197   :  { %v156_v56 = vmul.f32 %v387_v52, %v151_v51 }
 0x198   :  { %v145_v50 = vsub.f32 1.5, %v144_v49 }
 0x199   :  { %v161_v59 = vadd.f32 %v388_v57, %v156_v56 }
 0x19a   :  { %v146_v53 = vmul.f32 %v396_v44, %v145_v50 }
 0x19c   :  { %v150_v54 = vsel %vm149_vm7, %v396_v44, %v146_v53 }
 0x19d   :  { %v152_v55 = vmul.f32 %v150_v54, %v118_v28 }
 0x19f   :  { %v157_v58 = vmul.f32 %v387_v52, %v152_v55 }
 0x1a1   :  { %v162_v60 = vadd.f32 %v388_v57, %v157_v58 }
 0x1a3   :  { %v163_v61 = vpack.c.bf16 %v162_v60, %v161_v59 }
 0x1a5   :  { %354 = vmatmul.msk.bf16.vlgmr.msra.gmra.mxu1 %vm80_vm0, %v163_v61 }
 0x222   :  { %v196_v63 = vpop.f32.mrf.mxu1 }
 0x223   :  { %v197_v0 = vadd.f32 %v389_v62, %v196_v63 }
 0x225   :  { %v201_v1 = vpack.c.bf16 %v197_v0, %v197_v0  ;;  %v390_v0 = vld [vmem:[#allocation2] ss:$0 sm:$0xff] }
 0x227   :  { %v563_v2 = vunpack.c.l.bf16 %v201_v1 }
 0x229   :  { %v205_v3 = vmul.f32 %v563_v2, %v563_v2 }
 0x22a   :  { %v198_v4 = vpop.f32.mrf.mxu1 }
 0x22b   :  { %v207_v5 = vpack.c.bf16 %v205_v3, %v205_v3  ;;  %v199_v6 = vadd.f32 %v389_v62, %v198_v4 }
 0x22d   :  { %v209_v8 = vunpack.c.l.bf16 %v207_v5  ;;  %v202_v9 = vpack.c.bf16 %v199_v6, %v199_v6 }
 0x22f   :  { %v211_v10 = vmul.f32 %v209_v8, %v563_v2  ;;  %v204_v11 = vunpack.c.l.bf16 %v202_v9 }
 0x231   :  { %v213_v14 = vpack.c.bf16 %v211_v10, %v211_v10  ;;  %v206_v15 = vmul.f32 %v204_v11, %v204_v11 }
 0x233   :  { %v215_v17 = vunpack.c.l.bf16 %v213_v14  ;;  %v208_v18 = vpack.c.bf16 %v206_v15, %v206_v15 }
 0x235   :  { %v217_v19 = vmul.f32 0.044677734, %v215_v17  ;;  %v210_v20 = vunpack.c.l.bf16 %v208_v18 }
 0x237   :  { %v219_v22 = vpack.c.bf16 %v217_v19, %v217_v19  ;;  %v212_v23 = vmul.f32 %v210_v20, %v204_v11 }
 0x239   :  { %v221_v24 = vunpack.c.l.bf16 %v219_v22  ;;  %v214_v25 = vpack.c.bf16 %v212_v23, %v212_v23 }
 0x23b   :  { %v223_v27 = vadd.f32 %v221_v24, %v563_v2  ;;  %v216_v28 = vunpack.c.l.bf16 %v214_v25 }
 0x23d   :  { %v225_v29 = vpack.c.bf16 %v223_v27, %v223_v27  ;;  %v218_v30 = vmul.f32 0.044677734, %v216_v28 }
 0x23f   :  { %v227_v31 = vunpack.c.l.bf16 %v225_v29  ;;  %v220_v32 = vpack.c.bf16 %v218_v30, %v218_v30 }
 0x241   :  { %v229_v33 = vmul.f32 0.796875, %v227_v31  ;;  %v222_v34 = vunpack.c.l.bf16 %v220_v32 }
 0x243   :  { %v231_v35 = vpack.c.bf16 %v229_v33, %v229_v33  ;;  %v224_v36 = vadd.f32 %v222_v34, %v204_v11 }
 0x245   :  { %v233_v37 = vunpack.c.l.bf16 %v231_v35  ;;  %v226_v38 = vpack.c.bf16 %v224_v36, %v224_v36 }
 0x247   :  { %397 = vtanh.f32 %v233_v37  ;;  %v228_v39 = vunpack.c.l.bf16 %v226_v38 }
 0x249   :  { %v230_v40 = vmul.f32 0.796875, %v228_v39 }
 0x24b   :  { %v232_v41 = vpack.c.bf16 %v230_v40, %v230_v40 }
 0x24d   :  { %v398_v42 = vpop.eup %397  ;;  %v234_v43 = vunpack.c.l.bf16 %v232_v41 }
 0x24e   :  { %v237_v44 = vpack.c.bf16 %v398_v42, %v398_v42 }
 0x24f   :  { %399 = vtanh.f32 %v234_v43 }
 0x250   :  { %v239_v45 = vunpack.c.l.bf16 %v237_v44 }
 0x252   :  { %v241_v46 = vadd.f32 1.0, %v239_v45 }
 0x254   :  { %v243_v47 = vpack.c.bf16 %v241_v46, %v241_v46 }
 0x255   :  { %v400_v48 = vpop.eup %399 }
 0x256   :  { %v238_v49 = vpack.c.bf16 %v400_v48, %v400_v48  ;;  %v245_v50 = vunpack.c.l.bf16 %v243_v47 }
 0x258   :  { %v240_v51 = vunpack.c.l.bf16 %v238_v49  ;;  %v247_v53 = vmul.f32 0.5, %v245_v50 }
 0x25a   :  { %v242_v52 = vadd.f32 1.0, %v240_v51  ;;  %v249_v56 = vpack.c.bf16 %v247_v53, %v247_v53 }
 0x25c   :  { %v244_v54 = vpack.c.bf16 %v242_v52, %v242_v52  ;;  %v251_v59 = vunpack.c.l.bf16 %v249_v56 }
 0x25e   :  { %v246_v55 = vunpack.c.l.bf16 %v244_v54  ;;  %v253_v61 = vmul.f32 %v251_v59, %v563_v2 }
 0x260   :  { %v248_v57 = vmul.f32 0.5, %v246_v55 }
 0x262   :  { %v250_v58 = vpack.c.bf16 %v248_v57, %v248_v57 }
 0x264   :  { %v252_v60 = vunpack.c.l.bf16 %v250_v58 }
 0x266   :  { %v254_v62 = vmul.f32 %v252_v60, %v204_v11 }
 0x268   :  { %v255_v63 = vpack.c.bf16 %v254_v62, %v253_v61 }
 0x26a   :  { %371 = vmatmul.msk.bf16.vlgmr.msra.gmra.mxu2 %vm292_vm8, %v255_v63 }
 0x2ed   :  { %v305_v1 = vpop.f32.mrf.mxu2 }
 0x2ee   :  { %v306_v3 = vadd.f32 %v390_v0, %v305_v1 }
 0x2f0   :  { %v310_v4 = vadd.f32 %v306_v3, %v532_v7 }
 0x2f2   :  { %312 = vst.msk [vmem:[#allocation5] sm:$0xff] %vm80_vm0, %v310_v4 }
 0x2f5   :  { %v307_v5 = vpop.f32.mrf.mxu2 }
 0x2f6   :  { %v308_v6 = vadd.f32 %v390_v0, %v307_v5 }
 0x2f8   :  { %v311_v2 = vadd.f32 %v308_v6, %v539_v12 }
 0x2fa   :  { %313 = vst.msk [vmem:[#allocation5 + $0x8] sm:$0xff] %vm80_vm0, %v311_v2 }
 0x2fb   :  { %326 = dma.vmem_to_hbm [thread:$0]  %s319_s19, 256, %s321_s22, [#allocation4], %s456_s23, %s456_s23, %s457_s9  }
 0x2fc   :  { %451 = dma.done.wait [#allocation4], 256  }
 0x2fd   :  { %452 = vsyncadd [#allocation4], 4294967040 }
 0x2fe   :  { %331 = vsyncpa [#allocation3], 1 }
 0x2ff   :  { %332 = vsyncpa [#allocation4], 1 }

// kernel: _forward.3
= control target key start
LH: loop header
LB: loop body
LE: loop exit
PB: predicated region body
PF: predicated region fallthrough
CT: control target
= control target key end

     0   :  { %10 = vsyncpa [#allocation3], 0  ;;  %s310_s0 = inlined_call_operand.hbm [shape: f32[16,32], index: 0, kind: input, shape index: {}]   ;;  %s311_s1 = inlined_call_operand.vmem [shape: f32[1,32], index: 1, kind: input, shape index: {}]   ;;  %s312_s2 = inlined_call_operand.vmem [shape: f32[1,32], index: 2, kind: input, shape index: {}]   ;;  %s313_s3 = inlined_call_operand.hbm [shape: bf16[32,96], index: 3, kind: input, shape index: {}]   ;;  %s314_s4 = inlined_call_operand.vmem [shape: f32[1,96], index: 4, kind: input, shape index: {}]   ;;  %s315_s5 = inlined_call_operand.vmem [shape: bf16[16,96], index: 5, kind: output, shape index: {}]  }
   0x1   :  { %s16_s20 = sshll.u32 %s310_s0, 4  ;;  %s17_s20 = int_to_ptr.hbm [resolvable:$true] %s16_s20 }
   0x2   :  { %11 = vsyncpa [#allocation5], 0  ;;  %s247_s21 = smov [#allocation2]   ;;  %s33_s25 = sshll.u32 %s313_s3, 4  ;;  %s34_s25 = int_to_ptr.hbm [resolvable:$true] %s33_s25 }
   0x3   :  { %s18_s22 = sshll.u32 %s247_s21, 4  ;;  %s248_s26 = smov 128   ;;  %s19_s22 = int_to_ptr.vmem [resolvable:$true] %s18_s22 }
   0x4   :  { %s249_s27 = smov 8   ;;  %s250_s28 = smov [#allocation4]  }
   0x5   :  { %24 = dma.hbm_to_vmem [thread:$0]  %s17_s20, 256, %s19_s22, [#allocation3], %s248_s26, %s248_s26, %s249_s27  }
   0x6   :  { %s35_s29 = sshll.u32 %s250_s28, 4  ;;  %s251_s30 = smov 64   ;;  %s36_s29 = int_to_ptr.vmem [resolvable:$true] %s35_s29 }
   0x7   :  { %s252_s6 = smov 4  }
   0x8   :  { %41 = dma.hbm_to_vmem [thread:$0]  %s34_s25, 256, %s36_s29, [#allocation5], %s251_s30, %s251_s30, %s252_s6  }
   0x9   :  { %243 = dma.done.wait [#allocation3], 256  }
   0xa   :  { %244 = vsyncadd [#allocation3], 4294967040 }
   0xb   :  { %245 = dma.done.wait [#allocation5], 256  }
   0xc   :  { %246 = vsyncadd [#allocation5], 4294967040  ;;  %vm57_vm0 = vcmask 261120   ;;  %v53_v0 = vld [vmem:[#allocation2] sm:$0xff]  ;;  %v54_v2 = vld [vmem:[#allocation2 + $0x8] sm:$0xff]  ;;  %v253_v4 = vmov 32.0  }
   0xd   :  { %v58_v1 = vsel %vm57_vm0, %v53_v0, 0.0  ;;  %v61_v3 = vsel %vm57_vm0, %v54_v2, 0.0  ;;  %189 = vrcp.f32 %v253_v4  ;;  %v178_v21 = vld [vmem:[#allocation4 + $0x8] sm:$0xff]  ;;  %v177_v23 = vld [vmem:[#allocation4] sm:$0xff]  ;;  %v186_v42 = vld [vmem:[%s311_s1] ss:$0 sm:$0xff] }
   0xe   :  { %59 = vadd.xlane.f32.xlu0 %v58_v1  ;;  %149 = vmatpush.bf16.msra.mxu0 %v178_v21  ;;  %v187_v47 = vld [vmem:[%s312_s2] ss:$0 sm:$0xff]  ;;  %vm159_vm8 = vcmask 781312  }
   0xf   :  { %v188_v52 = vld [vmem:[%s314_s4] ss:$0 sm:$0xff] }
  0x12   :  { %150 = vmatpush.bf16.msra.mxu0 %v177_v23 }
  0x13   :  { %v190_v5 = vpop.eup %189 }
  0x14   :  { %v65_v6 = vmul.f32 32.0, %v190_v5  ;;  %vm69_vm1 = vweird.f32 %v190_v5 }
  0x16   :  { %62 = vadd.xlane.f32.xlu0 %v61_v3  ;;  %v66_v7 = vsub.f32 1.0, %v65_v6 }
  0x18   :  { %v67_v8 = vmul.f32 %v190_v5, %v66_v7 }
  0x1a   :  { %v68_v9 = vadd.f32 %v190_v5, %v67_v8 }
  0x1c   :  { %v70_v10 = vsel %vm69_vm1, %v190_v5, %v68_v9 }
  0x81   :  { %v60_v11 = vpop.xlane.xlu0 %59 }
  0x82   :  { %v71_v12 = vmul.f32 %v70_v10, %v60_v11 }
  0x84   :  { %v73_v13 = vsub.f32 %v53_v0, %v71_v12 }
  0x86   :  { %v75_v14 = vmul.f32 %v73_v13, %v73_v13 }
  0x88   :  { %v77_v15 = vsel %vm57_vm0, %v75_v14, 0.0 }
  0x89   :  { %78 = vadd.xlane.f32.xlu1 %v77_v15  ;;  %v63_v16 = vpop.xlane.xlu0 %62 }
  0x8a   :  { %v72_v17 = vmul.f32 %v70_v10, %v63_v16 }
  0x8c   :  { %v74_v18 = vsub.f32 %v54_v2, %v72_v17 }
  0x8e   :  { %v76_v19 = vmul.f32 %v74_v18, %v74_v18 }
  0x90   :  { %v80_v20 = vsel %vm57_vm0, %v76_v19, 0.0 }
  0x91   :  { %81 = vadd.xlane.f32.xlu1 %v80_v20 }
  0xfc   :  { %v79_v22 = vpop.xlane.xlu1 %78 }
  0xfd   :  { %v83_v24 = vmul.f32 %v79_v22, %v70_v10 }
  0xff   :  { %v85_v25 = vadd.f32 1e-06, %v83_v24 }
 0x101   :  { %191 = vrsqrt.f32 %v85_v25  ;;  %vm93_vm3 = vweird.f32 %v85_v25 }
 0x104   :  { %v82_v26 = vpop.xlane.xlu1 %81 }
 0x105   :  { %v84_v27 = vmul.f32 %v82_v26, %v70_v10 }
 0x107   :  { %v192_v28 = vpop.eup %191  ;;  %v86_v29 = vadd.f32 1e-06, %v84_v27 }
 0x108   :  { %v88_v30 = vmul.f32 %v192_v28, %v85_v25  ;;  %vm94_vm2 = vweird.f32 %v192_v28 }
 0x109   :  { %193 = vrsqrt.f32 %v86_v29  ;;  %vm95_vm4 = vmor %vm93_vm3, %vm94_vm2  ;;  %vm103_vm6 = vweird.f32 %v86_v29 }
 0x10a   :  { %v89_v31 = vmul.f32 %v192_v28, %v88_v30 }
 0x10c   :  { %v90_v32 = vmul.f32 0.5, %v89_v31 }
 0x10e   :  { %v91_v33 = vsub.f32 1.5, %v90_v32 }
 0x10f   :  { %v194_v34 = vpop.eup %193 }
 0x110   :  { %v92_v35 = vmul.f32 %v192_v28, %v91_v33  ;;  %v98_v36 = vmul.f32 %v194_v34, %v86_v29  ;;  %vm104_vm5 = vweird.f32 %v194_v34 }
 0x111   :  { %vm105_vm7 = vmor %vm103_vm6, %vm104_vm5 }
 0x112   :  { %v99_v37 = vmul.f32 %v194_v34, %v98_v36  ;;  %v96_v38 = vsel %vm95_vm4, %v192_v28, %v92_v35 }
 0x113   :  { %v107_v41 = vmul.f32 %v96_v38, %v73_v13 }
 0x114   :  { %v100_v39 = vmul.f32 0.5, %v99_v37 }
 0x115   :  { %v112_v46 = vmul.f32 %v186_v42, %v107_v41 }
 0x116   :  { %v101_v40 = vsub.f32 1.5, %v100_v39 }
 0x117   :  { %v117_v49 = vadd.f32 %v187_v47, %v112_v46 }
 0x118   :  { %v102_v43 = vmul.f32 %v194_v34, %v101_v40 }
 0x11a   :  { %v106_v44 = vsel %vm105_vm7, %v194_v34, %v102_v43 }
 0x11b   :  { %v108_v45 = vmul.f32 %v106_v44, %v74_v18 }
 0x11d   :  { %v113_v48 = vmul.f32 %v186_v42, %v108_v45 }
 0x11f   :  { %v118_v50 = vadd.f32 %v187_v47, %v113_v48 }
 0x121   :  { %v119_v51 = vpack.c.bf16 %v118_v50, %v117_v49 }
 0x123   :  { %176 = vmatmul.msk.bf16.vlgmr.msra.gmra.mxu0 %vm57_vm0, %v119_v51 }
 0x1a0   :  { %v152_v53 = vpop.f32.mrf.mxu0 }
 0x1a1   :  { %v153_v54 = vadd.f32 %v188_v52, %v152_v53 }
 0x1a3   :  { %v157_v55 = vpack.c.bf16 %v153_v54, %v153_v54 }
 0x1a5   :  { %160 = vst.msk [vmem:[%s315_s5] sm:$0xf] %vm159_vm8, %v157_v55 }
 0x1a8   :  { %v154_v56 = vpop.f32.mrf.mxu0 }
 0x1a9   :  { %v155_v57 = vadd.f32 %v188_v52, %v154_v56 }
 0x1ab   :  { %v158_v58 = vpack.c.bf16 %v155_v57, %v155_v57 }
 0x1ad   :  { %161 = vst.msk [vmem:[%s315_s5 + $0x4] sm:$0xf] %vm159_vm8, %v158_v58 }
 0x1ae   :  { %166 = vsyncpa [#allocation3], 1 }
 0x1af   :  { %167 = vsyncpa [#allocation5], 1 }

// kernel: _forward.4
= control target key start
LH: loop header
LB: loop body
LE: loop exit
PB: predicated region body
PF: predicated region fallthrough
CT: control target
= control target key end

     0   :  { %s573_s6 = smov 0   ;;  %s630_s0 = inlined_call_operand.vmem [shape: bf16[2,8,96], index: 0, kind: input, shape index: {}]   ;;  %s631_s1 = inlined_call_operand.vmem [shape: bf16[2,8,32], index: 1, kind: output, shape index: {}]  }
   0x1 LB: > { %s486_s7 = sadd.s32 4294967295, %s547_s6   ;;  %p490_p0 = scmp.ge.s32.totalorder %s547_s6, 1  ;;  %s547_s6 = sphi %s573_s6, %s11_s6  }
   0x2   : > { %p86_p1 = scmp.lt.s32.totalorder %s547_s6, 3 }
   0x4   : > { %p87_p2 = pnand %p490_p0, %p86_p1 }
   0x5   : > { %p104_p3 = scmp.lt.s32.totalorder (!%p87_p2), %s486_s7, 1  ;;  %s549_s12 = smov (!%p87_p2), 96  }
   0x6   : > { %90 = sbr.rel (%p87_p2) target bundleno = 923 (0x39b), region = 24  ;;  %s550_s13 = smov (!%p87_p2), 88  }
   0x7   : > { %s551_s14 = smov (!%p87_p2), 120   ;;  %s552_s15 = smov (!%p87_p2), 72  }
   0x8   : > { %s553_s16 = smov (!%p87_p2), 104   ;;  %s554_s17 = smov (!%p87_p2), 64  }
   0x9   : > { %s555_s18 = smov (!%p87_p2), 80   ;;  %s556_s19 = smov (!%p87_p2), 112  }
   0xa   : > { %s557_s20 = smov (!%p87_p2), 56   ;;  %s558_s21 = smov (!%p87_p2), 40  }
   0xb   : > { %s633_s7 = smov (!%p104_p3, %s486_s7), 1  ;;  %vm119_vm0 = vcmask 64512   ;;  %vm169_vm1 = vcmask 1043456   ;;  %s559_s22 = smov 48  }
   0xc   : > { %s491_s8 = sshll.u32 %s633_s7, 2  ;;  %s560_s23 = smov 8  }
   0xd   : > { %s589_s11 = scalar_lea.vmem %s630_s0, %s491_s8  ;;  %s561_s24 = smov 24  }
   0xe   : > { %v113_v0 = vld [vmem:[%s589_s11] sm:$0xf]  ;;  %s562_s25 = smov 16   ;;  %s111_s28 = scalar_lea.vmem %s631_s1, %s491_s8 }
   0xf   : > { %v190_v1 = vld [vmem:[%s589_s11] sm:$0xf]  ;;  %v115_v2 = vunpack.c.l.b16 %v113_v0 }
  0x10   : > { %v192_v3 = vunpack.c.l.b16 %v190_v1  ;;  %v352_v6 = vld [vmem:[%s589_s11] sm:$0xf] }
  0x11   : > { %v116_v4 = vpack.c.b16 %v115_v2, %v115_v2  ;;  %v354_v7 = vunpack.c.l.b16 %v352_v6  ;;  %v271_v17 = vld [vmem:[%s589_s11] sm:$0xf] }
  0x12   : > { %v193_v5 = vpack.c.b16 %v192_v3, %v192_v3  ;;  %v273_v18 = vunpack.c.l.b16 %v271_v17 }
  0x13   : > { %117 = vrot.lane.b32.xlu0 %v116_v4, %s549_s12  ;;  %v355_v8 = vpack.c.b16 %v354_v7, %v354_v7  ;;  %164 = vrot.lane.b32.xlu2 %v116_v4, %s554_s17 }
  0x14   : > { %196 = vrot.lane.b32.xlu1 %v193_v5, %s550_s13  ;;  %v274_v19 = vpack.c.b16 %v273_v18, %v273_v18 }
  0x1b   : > { %277 = vrot.lane.b32.xlu2 %v274_v19, %s555_s18 }
  0x1c   : > { %194 = vrot.lane.b32.xlu1 %v193_v5, %s551_s14 }
  0x23   : > { %275 = vrot.lane.b32.xlu2 %v274_v19, %s556_s19 }
  0x24   : > { %358 = vrot.lane.b32.xlu1 %v355_v8, %s552_s15 }
  0x2c   : > { %356 = vrot.lane.b32.xlu1 %v355_v8, %s553_s16 }
  0x34   : > { %242 = vrot.lane.b32.xlu1 %v193_v5, %s557_s20 }
  0x6d   : > { %v165_v27 = vpop.permute.xlu2 %164 }
  0x6e   : > { %v171_v29 = vsel %vm169_vm1, %v165_v27, 0 }
  0x6f   : > { %180 = vmatpush.bf16.msra.mxu1 %v171_v29 }
  0x75   : > { %v278_v30 = vpop.permute.xlu2 %277 }
  0x76   : > { %v283_v32 = vsel %vm119_vm0, %v278_v30, 0 }
  0x77   : > { %292 = vmatpush.bf16.xpose.msrb.mxu1 %v283_v32 }
  0x7d   : > { %v276_v38 = vpop.permute.xlu2 %275 }
  0x85   : > { %v118_v9 = vpop.permute.xlu0 %117 }
  0x86   : > { %v197_v10 = vpop.permute.xlu1 %196  ;;  %v124_v11 = vsel %vm119_vm0, %v118_v9, 0 }
  0x87   : > { %v202_v12 = vsel %vm119_vm0, %v197_v10, 0  ;;  %133 = vmatpush.bf16.xpose.msra.mxu0 %v124_v11 }
  0x88   : > { %211 = vmatpush.bf16.xpose.msra.mxu2 %v202_v12 }
  0x8e   : > { %v195_v13 = vpop.permute.xlu1 %194  ;;  %493 = vmatmul.msk.bf16.vlgmr.msra.gmra.mxu0 %vm119_vm0, %v113_v0 }
  0x8f   : > { %495 = vmatmul.msk.bf16.vlgmr.msra.gmra.mxu2 %vm119_vm0, %v195_v13 }
  0x96   : > { %v359_v14 = vpop.permute.xlu1 %358 }
  0x97   : > { %v364_v15 = vsel %vm119_vm0, %v359_v14, 0 }
  0x98   : > { %373 = vmatpush.bf16.xpose.msrb.mxu0 %v364_v15 }
  0x9e   : > { %v357_v16 = vpop.permute.xlu1 %356 }
  0x9f   : > { %499 = vmatmul.msk.bf16.vlgmr.msrb.gmra.mxu0 %vm119_vm0, %v357_v16 }
  0xa6   : > { %v243_v43 = vpop.permute.xlu1 %242 }
  0xa7   : > { %v248_v44 = vsel %vm169_vm1, %v243_v43, 0 }
  0xa8   : > { %257 = vmatpush.bf16.msra.mxu3 %v248_v44 }
 0x10b   : > { %v135_v20 = vpop.f32.mrf.mxu0 }
 0x10c   : > { %v139_v21 = vsel %vm119_vm0, %v135_v20, -inf }
 0x10d   : > { %140 = vmax.xlane.f32.xlu0 %v139_v21 }
 0x112   : > { %v213_v22 = vpop.f32.mrf.mxu2 }
 0x113   : > { %v137_v23 = vpop.f32.mrf.mxu0  ;;  %v217_v25 = vsel %vm119_vm0, %v213_v22, -inf }
 0x114   : > { %218 = vmax.xlane.f32.xlu2 %v217_v25 }
 0x11a   : > { %v215_v24 = vpop.f32.mrf.mxu2 }
 0x11c   : > { %v375_v26 = vpop.f32.mrf.mxu0 }
 0x11d   : > { %v379_v28 = vsel %vm119_vm0, %v375_v26, -inf }
 0x11e   : > { %380 = vmax.xlane.f32.xlu0 %v379_v28 }
 0x124   : > { %v377_v31 = vpop.f32.mrf.mxu0 }
 0x12c   : > { %404 = vrot.lane.b32.xlu2 %v355_v8, %s558_s21 }
 0x132   : > { %323 = vrot.lane.b32.xlu0 %v274_v19, %s559_s22 }
 0x180   : > { %v141_v33 = vpop.xlane.xlu0 %140 }
 0x181   : > { %v142_v34 = vsub.f32 %v135_v20, %v141_v33 }
 0x183   : > { %v143_v35 = vmul.f32 1.442695, %v142_v34 }
 0x185   : > { %525 = vpow2.f32 %v143_v35 }
 0x187   : > { %v219_v39 = vpop.xlane.xlu2 %218 }
 0x188   : > { %v220_v40 = vsub.f32 %v213_v22, %v219_v39 }
 0x18a   : > { %v221_v41 = vmul.f32 1.442695, %v220_v40 }
 0x18b   : > { %v526_v36 = vpop.eup %525 }
 0x18c   : > { %v163_v37 = vpack.c.bf16 %v526_v36, %v526_v36  ;;  %527 = vpow2.f32 %v221_v41  ;;  %v145_v12 = vsel %vm119_vm0, %v526_v36, 0.0 }
 0x18e   : > { %494 = vmatmul.msk.bf16.vlgmr.msra.gmra.mxu1 %vm119_vm0, %v163_v37 }
 0x18f   : > { %v405_v47 = vpop.permute.xlu2 %404 }
 0x190   : > { %v410_v48 = vsel %vm169_vm1, %v405_v47, 0 }
 0x191   : > { %419 = vmatpush.bf16.msrb.mxu2 %v410_v48  ;;  %v381_v49 = vpop.xlane.xlu0 %380 }
 0x192   : > { %v528_v42 = vpop.eup %527  ;;  %v382_v50 = vsub.f32 %v375_v26, %v381_v49 }
 0x193   : > { %v223_v45 = vsel %vm119_vm0, %v528_v42, 0.0  ;;  %v241_v46 = vpack.c.bf16 %v528_v42, %v528_v42 }
 0x194   : > { %224 = vadd.xlane.f32.xlu0 %v223_v45  ;;  %v383_v51 = vmul.f32 1.442695, %v382_v50 }
 0x195   : > { %496 = vmatmul.msk.bf16.vlgmr.msra.gmra.mxu3 %vm119_vm0, %v241_v46 }
 0x196   : > { %529 = vpow2.f32 %v383_v51 }
 0x19c   : > { %v530_v52 = vpop.eup %529 }
 0x19d   : > { %v385_v53 = vsel %vm119_vm0, %v530_v52, 0.0  ;;  %v403_v54 = vpack.c.bf16 %v530_v52, %v530_v52 }
 0x19e   : > { %497 = vmatmul.msk.bf16.vlgmr.msrb.gmra.mxu1 %vm119_vm0, %v276_v38  ;;  %386 = vadd.xlane.f32.xlu2 %v385_v53 }
 0x19f   : > { %500 = vmatmul.msk.bf16.vlgmr.msrb.gmra.mxu2 %vm119_vm0, %v403_v54 }
 0x1a4   : > { %v324_v61 = vpop.permute.xlu0 %323 }
 0x1a5   : > { %v329_v63 = vsel %vm169_vm1, %v324_v61, 0 }
 0x1a6   : > { %338 = vmatpush.bf16.msrb.mxu3 %v329_v63 }
 0x207   : > { %v225_v5 = vpop.xlane.xlu0 %224 }
 0x208   : > { %vm231_vm2 = vweird.f32 %v225_v5  ;;  %v237_v17 = vand.u32 2147483648, %v225_v5  ;;  %v235_v20 = vand.u32 2147483647, %v225_v5 }
 0x20a   : > { %v238_v21 = vor.u32 1.1754944e-38, %v237_v17  ;;  %vm236_vm5 = vcmp.eq.f32.partialorder %v235_v20, 8.507059e+37 }
 0x20b   : > { %v614_v55 = vpop.f32.mrf.mxu1 }
 0x211   : > { %v387_v9 = vpop.xlane.xlu2 %386 }
 0x212   : > { %vm393_vm6 = vweird.f32 %v387_v9  ;;  %v399_v24 = vand.u32 2147483648, %v387_v9  ;;  %v397_v27 = vand.u32 2147483647, %v387_v9 }
 0x213   : > { %v184_v56 = vpop.f32.mrf.mxu1 }
 0x214   : > { %v400_v29 = vor.u32 1.1754944e-38, %v399_v24  ;;  %vm398_vm9 = vcmp.eq.f32.partialorder %v397_v27, 8.507059e+37 }
 0x218   : > { %v259_v60 = vpop.f32.mrf.mxu3 }
 0x21b   : > { %v294_v57 = vpop.f32.mrf.mxu1 }
 0x21c   : > { %v298_v58 = vsel %vm119_vm0, %v294_v57, -inf }
 0x21d   : > { %299 = vmax.xlane.f32.xlu1 %v298_v58 }
 0x220   : > { %v261_v62 = vpop.f32.mrf.mxu3 }
 0x222   : > { %v421_v0 = vpop.f32.mrf.mxu2 }
 0x223   : > { %v296_v59 = vpop.f32.mrf.mxu1 }
 0x22a   : > { %v423_v1 = vpop.f32.mrf.mxu2 }
 0x290   : > { %v300_v2 = vpop.xlane.xlu1 %299 }
 0x291   : > { %v301_v3 = vsub.f32 %v294_v57, %v300_v2 }
 0x293   : > { %v302_v4 = vmul.f32 1.442695, %v301_v3 }
 0x295   : > { %531 = vpow2.f32 %v302_v4 }
 0x296   : > { %533 = vrcp.f32 %v225_v5 }
 0x297   : > { %535 = vrcp.f32 %v387_v9 }
 0x29b   : > { %v532_v6 = vpop.eup %531 }
 0x29c   : > { %v304_v7 = vsel %vm119_vm0, %v532_v6, 0.0  ;;  %v322_v8 = vpack.c.bf16 %v532_v6, %v532_v6  ;;  %v534_v10 = vpop.eup %533 }
 0x29d   : > { %305 = vadd.xlane.f32.xlu1 %v304_v7  ;;  %v227_v11 = vmul.f32 %v534_v10, %v225_v5  ;;  %v536_v14 = vpop.eup %535  ;;  %vm232_vm3 = vweird.f32 %v534_v10 }
 0x29e   : > { %498 = vmatmul.msk.bf16.vlgmr.msrb.gmra.mxu3 %vm119_vm0, %v322_v8  ;;  %v389_v15 = vmul.f32 %v536_v14, %v387_v9  ;;  %vm233_vm4 = vmor %vm231_vm2, %vm232_vm3  ;;  %vm394_vm7 = vweird.f32 %v536_v14  ;;  %vm188_vm2 = vcmask 60416   ;;  %vm269_vm3 = vcmask 126016  }
 0x29f   : > { %v228_v13 = vsub.f32 1.0, %v227_v11  ;;  %vm395_vm8 = vmor %vm393_vm6, %vm394_vm7 }
 0x2a0   : > { %v390_v18 = vsub.f32 1.0, %v389_v15 }
 0x2a1   : > { %v229_v16 = vmul.f32 %v534_v10, %v228_v13 }
 0x2a2   : > { %v391_v22 = vmul.f32 %v536_v14, %v390_v18 }
 0x2a3   : > { %v230_v19 = vadd.f32 %v534_v10, %v229_v16 }
 0x2a4   : > { %v392_v26 = vadd.f32 %v536_v14, %v391_v22 }
 0x2a5   : > { %146 = vadd.xlane.f32.xlu1 %v145_v12  ;;  %v234_v23 = vsel %vm233_vm4, %v534_v10, %v230_v19  ;;  %vm350_vm4 = vcmask 191616  }
 0x2a6   : > { %v239_v25 = vsel %vm236_vm5, %v238_v21, %v234_v23  ;;  %v396_v30 = vsel %vm395_vm8, %v536_v14, %v392_v26  ;;  %vm431_vm5 = vcmask 257216  }
 0x2a7   : > { %v263_v28 = vmul.f32 %v259_v60, %v239_v25  ;;  %v401_v32 = vsel %vm398_vm9, %v400_v29, %v396_v30 }
 0x2a8   : > { %v425_v33 = vmul.f32 %v421_v0, %v401_v32 }
 0x2a9   : > { %v264_v31 = vpack.c.bf16 %v263_v28, %v263_v28 }
 0x2aa   : > { %v426_v34 = vpack.c.bf16 %v425_v33, %v425_v33 }
 0x2be   : > { %266 = vrot.lane.b32.xlu1 %v264_v31, %s560_s23 }
 0x2c6   : > { %428 = vrot.lane.b32.xlu1 %v426_v34, %s561_s24 }
 0x310   : > { %v306_v35 = vpop.xlane.xlu1 %305 }
 0x311   : > { %537 = vrcp.f32 %v306_v35  ;;  %v318_v40 = vand.u32 2147483648, %v306_v35  ;;  %v316_v42 = vand.u32 2147483647, %v306_v35  ;;  %vm312_vm11 = vweird.f32 %v306_v35 }
 0x313   : > { %v319_v45 = vor.u32 1.1754944e-38, %v318_v40  ;;  %vm317_vm13 = vcmp.eq.f32.partialorder %v316_v42, 8.507059e+37 }
 0x317   : > { %v538_v36 = vpop.eup %537 }
 0x318   : > { %v308_v37 = vmul.f32 %v538_v36, %v306_v35  ;;  %v147_v38 = vpop.xlane.xlu1 %146  ;;  %vm313_vm10 = vweird.f32 %v538_v36 }
 0x319   : > { %539 = vrcp.f32 %v147_v38  ;;  %vm314_vm12 = vmor %vm312_vm11, %vm313_vm10  ;;  %v159_v52 = vand.u32 2147483648, %v147_v38  ;;  %v157_v54 = vand.u32 2147483647, %v147_v38  ;;  %vm153_vm15 = vweird.f32 %v147_v38 }
 0x31a   : > { %v309_v39 = vsub.f32 1.0, %v308_v37 }
 0x31b   : > { %v160_v58 = vor.u32 1.1754944e-38, %v159_v52  ;;  %vm158_vm1 = vcmp.eq.f32.partialorder %v157_v54, 8.507059e+37 }
 0x31c   : > { %v310_v41 = vmul.f32 %v538_v36, %v309_v39 }
 0x31e   : > { %v311_v43 = vadd.f32 %v538_v36, %v310_v41 }
 0x31f   : > { %v540_v44 = vpop.eup %539 }
 0x320   : > { %v149_v46 = vmul.f32 %v540_v44, %v147_v38  ;;  %v315_v47 = vsel %vm314_vm12, %v538_v36, %v311_v43  ;;  %vm154_vm14 = vweird.f32 %v540_v44 }
 0x321   : > { %v320_v48 = vsel %vm317_vm13, %v319_v45, %v315_v47  ;;  %v340_v49 = vpop.f32.mrf.mxu3  ;;  %vm155_vm0 = vmor %vm153_vm15, %vm154_vm14 }
 0x322   : > { %v150_v50 = vsub.f32 1.0, %v149_v46  ;;  %v344_v51 = vmul.f32 %v340_v49, %v320_v48 }
 0x324   : > { %v151_v53 = vmul.f32 %v540_v44, %v150_v50  ;;  %v345_v56 = vpack.c.bf16 %v344_v51, %v344_v51 }
 0x326   : > { %v152_v57 = vadd.f32 %v540_v44, %v151_v53  ;;  %347 = vrot.lane.b32.xlu0 %v345_v56, %s562_s25 }
 0x328   : > { %v156_v59 = vsel %vm155_vm0, %v540_v44, %v152_v57 }
 0x329   : > { %v161_v60 = vsel %vm158_vm1, %v160_v58, %v156_v59  ;;  %v342_v61 = vpop.f32.mrf.mxu3 }
 0x32a   : > { %v186_v62 = vmul.f32 %v614_v55, %v161_v60 }
 0x32c   : > { %v187_v63 = vpack.c.bf16 %v186_v62, %v186_v62 }
 0x32e   : > { %189 = vst.msk [vmem:[%s111_s28] sm:$0xf] %vm188_vm2, %v187_v63 }
 0x330   : > { %v267_v0 = vpop.permute.xlu1 %266 }
 0x331   : > { %270 = vst.msk [vmem:[%s111_s28] sm:$0xf] %vm269_vm3, %v267_v0 }
 0x338   : > { %v429_v2 = vpop.permute.xlu1 %428 }
 0x398   : > { %v348_v1 = vpop.permute.xlu0 %347 }
 0x399   : > { %351 = vst.msk [vmem:[%s111_s28] sm:$0xf] %vm350_vm4, %v348_v1 }
 0x39a   : > { %432 = vst.msk [vmem:[%s111_s28] sm:$0xf] %vm431_vm5, %v429_v2 }
 0x39b PF: > { %s11_s6 = sadd.s32 1, %s547_s6  }
 0x39c   : > { %p8_p4 = scmp.ge.s32.totalorder %s11_s6, 4  }
 0x39e   :  { %10 = sbr.rel (!%p8_p4) target bundleno = 1 (0x1), region = 54 }

</bundles_post_ra>
